<compile_context>
chip_gen: v7x
topology: tpu7x:2x2x1
jax: 0.10.0
libtpu: 0.0.40
codegen_flags: <defaults>
</compile_context>

<pallas_src>
import jax
import jax.numpy as jnp
from jax.experimental import pallas as pl
from jax.experimental.pallas import tpu as pltpu

_LANE = 128
_SUBLANE = 8
_DEFAULT_BATCH_TILE_CAP = 512  # safe on v5e's 16 MiB default scoped VMEM


def _round_up(n, m):
    return ((n + m - 1) // m) * m


def _pad_to(a, shape):
    pads = [(0, t - s) for s, t in zip(a.shape, shape)]
    if all(p == (0, 0) for p in pads):
        return a
    return jnp.pad(a, pads)


def _mlp_kernel(x_ref, w1_ref, b1_ref, w2_ref, b2_ref, w3_ref, b3_ref, o_ref):
    # fc1 -> ReLU -> (dropout == identity) -> fc2 -> ReLU -> (dropout) -> fc3
    # MXU operands in bf16, accumulation + bias/ReLU in f32.  The f32->bf16 cast of x runs on
    # the VPU (free slot under the MXU pushes), so the wrapper never writes a bf16 copy of x.
    x = x_ref[...].astype(jnp.bfloat16)
    h1 = jnp.dot(x, w1_ref[...], preferred_element_type=jnp.float32)
    h1 = jnp.maximum(h1 + b1_ref[...], 0.0)
    h2 = jnp.dot(h1.astype(jnp.bfloat16), w2_ref[...], preferred_element_type=jnp.float32)
    h2 = jnp.maximum(h2 + b2_ref[...], 0.0)
    # Padded output columns (>= D_out) stay exactly zero (zero weight cols + zero bias);
    # the wrapper slices them off.
    o_ref[...] = (
        jnp.dot(h2.astype(jnp.bfloat16), w3_ref[...], preferred_element_type=jnp.float32)
        + b3_ref[...]
    )


def prepare_ndd_params(w1, b1, w2, b2, w3, b3):
    """Pad the N (output-feature) dims to 128-lane multiples and cast weights to bf16.

    Call ONCE and cache the result.  Re-doing this per forward call roughly doubles the HBM
    traffic of a kernel whose resident working set is the ~1.7 MB of weights.
    Shapes: w*: (in, out), b*: (1, out)  (i.e. PyTorch nn.Linear weights transposed).
    """
    D_in, H1 = w1.shape
    H2 = w2.shape[1]
    D_out = w3.shape[1]
    H1_p = _round_up(H1, _LANE)        # 400 -> 512
    H2_p = _round_up(H2, _LANE)        # 300 -> 384
    D_out_p = _round_up(D_out, _LANE)  # 1   -> 128
    # Contraction (K) dims stay unpadded — the kernel uses full-extent K blocks — while the
    # N dims are zero-padded so every MXU tile and the output store are lane-dense and exact.
    w1_p = _pad_to(w1, (D_in, H1_p)).astype(jnp.bfloat16)
    w2_p = _pad_to(w2, (H1_p, H2_p)).astype(jnp.bfloat16)
    w3_p = _pad_to(w3, (H2_p, D_out_p)).astype(jnp.bfloat16)
    b1_p = _pad_to(b1, (1, H1_p)).astype(jnp.float32)
    b2_p = _pad_to(b2, (1, H2_p)).astype(jnp.float32)
    b3_p = _pad_to(b3, (1, D_out_p)).astype(jnp.float32)
    return (w1_p, b1_p, w2_p, b2_p, w3_p, b3_p)


def ndd_code_forward(x, padded_params, d_out, *, batch_tile_cap=_DEFAULT_BATCH_TILE_CAP):
    """x: (B, D_in) f32.  padded_params: output of prepare_ndd_params (cached)."""
    w1_p, b1_p, w2_p, b2_p, w3_p, b3_p = padded_params
    B, D_in = x.shape
    assert D_in == w1_p.shape[0], (D_in, w1_p.shape)
    H1_p = w1_p.shape[1]
    H2_p = w2_p.shape[1]
    D_out_p = w3_p.shape[1]

    # Single grid step whenever the (8-rounded) batch fits under the tile cap; only tile for
    # large batches.  Splitting small batches just pays extra step overhead (v5e/v6e are a
    # single TC) and duplicates the weight DMA across v7x's two TensorCores.
    B8 = _round_up(max(B, 1), _SUBLANE)
    batch_tile = B8 if B8 <= batch_tile_cap else batch_tile_cap
    B_p = _round_up(B, batch_tile)

    x_p = _pad_to(x.astype(jnp.float32), (B_p, D_in))  # row pad only (no-op if B % tile == 0)

    grid = (B_p // batch_tile,)
    resident = lambda i: (0, 0)  # weights/biases never move across the grid

    out_p = pl.pallas_call(
        _mlp_kernel,
        out_shape=jax.ShapeDtypeStruct((B_p, D_out_p), jnp.float32),
        grid_spec=pl.GridSpec(
            grid=grid,
            in_specs=[
                # x tile: f32, full-extent K (1096 == array dim, so the (8,128) rule is met).
                pl.BlockSpec((batch_tile, D_in), lambda i: (i, 0)),
                pl.BlockSpec((D_in, H1_p), resident, pipeline_mode=pl.Buffered(1)),     # w1
                pl.BlockSpec((1, H1_p), resident, pipeline_mode=pl.Buffered(1)),         # b1
                pl.BlockSpec((H1_p, H2_p), resident, pipeline_mode=pl.Buffered(1)),      # w2
                pl.BlockSpec((1, H2_p), resident, pipeline_mode=pl.Buffered(1)),         # b2
                pl.BlockSpec((H2_p, D_out_p), resident, pipeline_mode=pl.Buffered(1)),   # w3
                pl.BlockSpec((1, D_out_p), resident, pipeline_mode=pl.Buffered(1)),      # b3
            ],
            out_specs=pl.BlockSpec((batch_tile, D_out_p), lambda i: (i, 0)),
        ),
        compiler_params=pltpu.CompilerParams(
            # Megacore split only pays once each v7x TC gets ~512+ rows; below that it merely
            # duplicates the resident-weight DMA, so keep the axis "arbitrary".
            dimension_semantics=("parallel",) if B >= 1024 else ("arbitrary",),
        ),
    )(x_p, w1_p, b1_p, w2_p, b2_p, w3_p, b3_p)

    return out_p[:B, :d_out]


def ndd_code_apply(x, w1, b1, w2, b2, w3, b3):
    """One-off convenience (prep + forward). Prefer caching prepare_ndd_params() yourself."""
    return ndd_code_forward(x, prepare_ndd_params(w1, b1, w2, b2, w3, b3), w3.shape[1])


def _xavier_normal(key, fan_in, fan_out):
    # matches nn.init.xavier_normal_: std = sqrt(2 / (fan_in + fan_out))
    std = jnp.sqrt(2.0 / (fan_in + fan_out))
    return jax.random.normal(key, (fan_in, fan_out), dtype=jnp.float32) * std


def init_params(key, D_in=1096, H1=400, H2=300, D_out=1):
    ks = jax.random.split(key, 6)
    w1 = _xavier_normal(ks[0], D_in, H1)
    b1 = jax.random.uniform(ks[1], (1, H1), minval=-1.0, maxval=0.0, dtype=jnp.float32)
    w2 = _xavier_normal(ks[2], H1, H2)
    b2 = jax.random.uniform(ks[3], (1, H2), minval=-1.0, maxval=0.0, dtype=jnp.float32)
    w3 = _xavier_normal(ks[4], H2, D_out)
    b3 = jax.random.uniform(ks[5], (1, D_out), minval=-1.0, maxval=0.0, dtype=jnp.float32)
    return w1, b1, w2, b2, w3, b3


def reference_forward_f32(x, w1, b1, w2, b2, w3, b3):
    h1 = jnp.maximum(x @ w1 + b1, 0.0)
    h2 = jnp.maximum(h1 @ w2 + b2, 0.0)
    return h2 @ w3 + b3


def reference_forward_bf16(x, w1, b1, w2, b2, w3, b3):
    # Mirrors the kernel's precision choices (bf16 MXU operands, f32 accumulation/elementwise).
    bf = jnp.bfloat16
    h1 = jnp.dot(x.astype(bf), w1.astype(bf), preferred_element_type=jnp.float32) + b1
    h1 = jnp.maximum(h1, 0.0)
    h2 = jnp.dot(h1.astype(bf), w2.astype(bf), preferred_element_type=jnp.float32) + b2
    h2 = jnp.maximum(h2, 0.0)
    return jnp.dot(h2.astype(bf), w3.astype(bf), preferred_element_type=jnp.float32) + b3


if __name__ == "__main__":
    key = jax.random.PRNGKey(0)
    k_x, k_p = jax.random.split(key)

    # Module-fixed feature dims (D_in/H1/H2/D_out come from NDD_Code), small batch.
    D_in, H1, H2, D_out = 1096, 400, 300, 1
    B = 8
    x = jax.random.normal(k_x, (B, D_in), dtype=jnp.float32)
    raw_params = init_params(k_p, D_in, H1, H2, D_out)

    # Pad + bf16-cast weights ONCE (hoisted out of the forward path) and reuse.
    padded_params = jax.block_until_ready(prepare_ndd_params(*raw_params))

    out = ndd_code_forward(x, padded_params, D_out)
    out = jax.block_until_ready(out)
    assert out.shape == (B, D_out), out.shape

    # Tight check vs. a reference with identical bf16/f32 precision choices.
    ref_bf16 = reference_forward_bf16(x, *raw_params)
    err_bf16 = float(jnp.max(jnp.abs(out - ref_bf16)))
    assert err_bf16 < 1e-2, f"mismatch vs. bf16 reference: {err_bf16}"

    # Looser sanity check vs. the pure-f32 reference (bf16 quantization error only).
    ref_f32 = reference_forward_f32(x, *raw_params)
    err_f32 = float(jnp.max(jnp.abs(out - ref_f32)))
    assert err_f32 < 1e-1, f"mismatch vs. f32 reference: {err_f32}"

    print("KERNEL_OK")
</pallas_src>

<mosaic_0001>
module attributes {stable_mosaic.version = 11 : i64} {
  func.func @_mlp_kernel(%arg0: i32, %arg1: memref<8x1096xf32, #tpu.memory_space<vmem>>, %arg2: memref<1096x512xbf16, #tpu.memory_space<vmem>>, %arg3: memref<1x512xf32, #tpu.memory_space<vmem>>, %arg4: memref<512x384xbf16, #tpu.memory_space<vmem>>, %arg5: memref<1x384xf32, #tpu.memory_space<vmem>>, %arg6: memref<384x128xbf16, #tpu.memory_space<vmem>>, %arg7: memref<1x128xf32, #tpu.memory_space<vmem>>, %arg8: memref<8x128xf32, #tpu.memory_space<vmem>>) attributes {dimension_semantics = [#tpu.dimension_semantics<arbitrary>], iteration_bounds = array<i64: 1>, scalar_prefetch = 0 : i64, scratch_operands = 0 : i64, tpu.core_type = #tpu.core_type<tc>, window_params = [{transform_indices = @transform_0, window_bounds = array<i64: 8, 1096>}, {pipeline_mode = #tpu.pipeline_mode<synchronous>, transform_indices = @transform_1, window_bounds = array<i64: 1096, 512>}, {pipeline_mode = #tpu.pipeline_mode<synchronous>, transform_indices = @transform_2, window_bounds = array<i64: 1, 512>}, {pipeline_mode = #tpu.pipeline_mode<synchronous>, transform_indices = @transform_3, window_bounds = array<i64: 512, 384>}, {pipeline_mode = #tpu.pipeline_mode<synchronous>, transform_indices = @transform_4, window_bounds = array<i64: 1, 384>}, {pipeline_mode = #tpu.pipeline_mode<synchronous>, transform_indices = @transform_5, window_bounds = array<i64: 384, 128>}, {pipeline_mode = #tpu.pipeline_mode<synchronous>, transform_indices = @transform_6, window_bounds = array<i64: 1, 128>}, {transform_indices = @transform_7, window_bounds = array<i64: 8, 128>}]} {
    %c0 = arith.constant 0 : index
    %c0_0 = arith.constant 0 : index
    %0 = vector.load %arg1[%c0, %c0_0] : memref<8x1096xf32, #tpu.memory_space<vmem>>, vector<8x1096xf32>
    %1 = arith.truncf %0 : vector<8x1096xf32> to vector<8x1096xbf16>
    %c0_1 = arith.constant 0 : index
    %c0_2 = arith.constant 0 : index
    %2 = vector.load %arg2[%c0_1, %c0_2] : memref<1096x512xbf16, #tpu.memory_space<vmem>>, vector<1096x512xbf16>
    %cst = arith.constant dense<0.000000e+00> : vector<8x512xf32>
    %3 = tpu.matmul %1, %2, %cst {dimension_numbers = #tpu.dot_dimension_numbers<[1], [0], [0], [1], [0, 0, 1, 1], [], []>} : vector<8x1096xbf16>, vector<1096x512xbf16>, vector<8x512xf32> -> vector<8x512xf32>
    %c0_3 = arith.constant 0 : index
    %c0_4 = arith.constant 0 : index
    %4 = vector.load %arg3[%c0_3, %c0_4] : memref<1x512xf32, #tpu.memory_space<vmem>>, vector<1x512xf32>
    %5 = vector.broadcast %4 : vector<1x512xf32> to vector<8x512xf32>
    %6 = arith.addf %3, %5 : vector<8x512xf32>
    %cst_5 = arith.constant 0.000000e+00 : f32
    %7 = vector.broadcast %cst_5 : f32 to vector<8x512xf32>
    %8 = arith.maximumf %6, %7 : vector<8x512xf32>
    %9 = arith.truncf %8 : vector<8x512xf32> to vector<8x512xbf16>
    %c0_6 = arith.constant 0 : index
    %c0_7 = arith.constant 0 : index
    %10 = vector.load %arg4[%c0_6, %c0_7] : memref<512x384xbf16, #tpu.memory_space<vmem>>, vector<512x384xbf16>
    %cst_8 = arith.constant dense<0.000000e+00> : vector<8x384xf32>
    %11 = tpu.matmul %9, %10, %cst_8 {dimension_numbers = #tpu.dot_dimension_numbers<[1], [0], [0], [1], [0, 0, 1, 1], [], []>} : vector<8x512xbf16>, vector<512x384xbf16>, vector<8x384xf32> -> vector<8x384xf32>
    %c0_9 = arith.constant 0 : index
    %c0_10 = arith.constant 0 : index
    %12 = vector.load %arg5[%c0_9, %c0_10] : memref<1x384xf32, #tpu.memory_space<vmem>>, vector<1x384xf32>
    %13 = vector.broadcast %12 : vector<1x384xf32> to vector<8x384xf32>
    %14 = arith.addf %11, %13 : vector<8x384xf32>
    %cst_11 = arith.constant 0.000000e+00 : f32
    %15 = vector.broadcast %cst_11 : f32 to vector<8x384xf32>
    %16 = arith.maximumf %14, %15 : vector<8x384xf32>
    %17 = arith.truncf %16 : vector<8x384xf32> to vector<8x384xbf16>
    %c0_12 = arith.constant 0 : index
    %c0_13 = arith.constant 0 : index
    %18 = vector.load %arg6[%c0_12, %c0_13] : memref<384x128xbf16, #tpu.memory_space<vmem>>, vector<384x128xbf16>
    %cst_14 = arith.constant dense<0.000000e+00> : vector<8x128xf32>
    %19 = tpu.matmul %17, %18, %cst_14 {dimension_numbers = #tpu.dot_dimension_numbers<[1], [0], [0], [1], [0, 0, 1, 1], [], []>} : vector<8x384xbf16>, vector<384x128xbf16>, vector<8x128xf32> -> vector<8x128xf32>
    %c0_15 = arith.constant 0 : index
    %c0_16 = arith.constant 0 : index
    %20 = vector.load %arg7[%c0_15, %c0_16] : memref<1x128xf32, #tpu.memory_space<vmem>>, vector<1x128xf32>
    %21 = vector.broadcast %20 : vector<1x128xf32> to vector<8x128xf32>
    %22 = arith.addf %19, %21 : vector<8x128xf32>
    %c0_17 = arith.constant 0 : index
    %c0_18 = arith.constant 0 : index
    %23 = vector.load %arg8[%c0_17, %c0_18] : memref<8x128xf32, #tpu.memory_space<vmem>>, vector<8x128xf32>
    tpu.vector_store %arg8[%c0_17, %c0_18], %22 {strides = array<i32>} : memref<8x128xf32, #tpu.memory_space<vmem>>, vector<8x128xf32>,
    return
  }
  func.func @transform_0(%arg0: i32) -> (i32, i32) {
    %c0_i32 = arith.constant 0 : i32
    %c0_i32_0 = arith.constant 0 : i32
    return %arg0, %c0_i32 : i32, i32
  }
  func.func @transform_1(%arg0: i32) -> (i32, i32) {
    %c0_i32 = arith.constant 0 : i32
    %c0_i32_0 = arith.constant 0 : i32
    %c0_i32_1 = arith.constant 0 : i32
    return %c0_i32, %c0_i32_0 : i32, i32
  }
  func.func @transform_2(%arg0: i32) -> (i32, i32) {
    %c0_i32 = arith.constant 0 : i32
    %c0_i32_0 = arith.constant 0 : i32
    %c0_i32_1 = arith.constant 0 : i32
    return %c0_i32, %c0_i32_0 : i32, i32
  }
  func.func @transform_3(%arg0: i32) -> (i32, i32) {
    %c0_i32 = arith.constant 0 : i32
    %c0_i32_0 = arith.constant 0 : i32
    %c0_i32_1 = arith.constant 0 : i32
    return %c0_i32, %c0_i32_0 : i32, i32
  }
  func.func @transform_4(%arg0: i32) -> (i32, i32) {
    %c0_i32 = arith.constant 0 : i32
    %c0_i32_0 = arith.constant 0 : i32
    %c0_i32_1 = arith.constant 0 : i32
    return %c0_i32, %c0_i32_0 : i32, i32
  }
  func.func @transform_5(%arg0: i32) -> (i32, i32) {
    %c0_i32 = arith.constant 0 : i32
    %c0_i32_0 = arith.constant 0 : i32
    %c0_i32_1 = arith.constant 0 : i32
    return %c0_i32, %c0_i32_0 : i32, i32
  }
  func.func @transform_6(%arg0: i32) -> (i32, i32) {
    %c0_i32 = arith.constant 0 : i32
    %c0_i32_0 = arith.constant 0 : i32
    %c0_i32_1 = arith.constant 0 : i32
    return %c0_i32, %c0_i32_0 : i32, i32
  }
  func.func @transform_7(%arg0: i32) -> (i32, i32) {
    %c0_i32 = arith.constant 0 : i32
    %c0_i32_0 = arith.constant 0 : i32
    return %arg0, %c0_i32 : i32, i32
  }
}

</mosaic_0001>

<bundles_post_ra>
// kernel: tpu_custom_call.1
= control target key start
LH: loop header
LB: loop body
LE: loop exit
PB: predicated region body
PF: predicated region fallthrough
CT: control target
= control target key end

     0   :  { %12 = vsyncpa [#allocation3], 0  ;;  %s4842_s0 = inlined_call_operand.hbm [shape: f32[8,1096], index: 0, kind: input, shape index: {}]   ;;  %s4843_s1 = inlined_call_operand.hbm [shape: bf16[1096,512], index: 1, kind: input, shape index: {}]   ;;  %s4844_s2 = inlined_call_operand.hbm [shape: f32[1,512], index: 2, kind: input, shape index: {}]   ;;  %s4845_s3 = inlined_call_operand.hbm [shape: bf16[512,384], index: 3, kind: input, shape index: {}]   ;;  %s4846_s4 = inlined_call_operand.hbm [shape: f32[1,384], index: 4, kind: input, shape index: {}]   ;;  %s4847_s5 = inlined_call_operand.hbm [shape: bf16[384,128], index: 5, kind: input, shape index: {}]   ;;  %s4848_s6 = inlined_call_operand.hbm [shape: f32[1,128], index: 6, kind: input, shape index: {}]   ;;  %s4849_s7 = inlined_call_operand.hbm [shape: f32[8,128], index: 7, kind: output, shape index: {}]  }
   0x1   :  { %13 = vsyncpa [#allocation6], 0 }
   0x2   :  { %14 = vsyncpa [#allocation9], 0 }
   0x3   :  { %15 = vsyncpa [#allocation12], 0 }
   0x4   :  { %16 = vsyncpa [#allocation4], 0  ;;  %s4662_s24 = smov [#allocation5]   ;;  %s4476_s28 = scalar_lea.hbm %s4843_s1, 35072 }
   0x5   :  { %s32_s25 = sshll.u32 %s4662_s24, 4  ;;  %p4477_p0 = scmp.ne.s32.totalorder %s4843_s1, %s4476_s28  ;;  %s33_s25 = int_to_ptr.vmem [resolvable:$true] %s32_s25 }
   0x6   :  { %p4480_p1 = scmp.lt.u32.totalorder %s4476_s28, %s4843_s1 }
   0x8   :  { %p4482_p2 = pnand %p4480_p1, %p4477_p0 }
   0xa   :  { %4485 = shalt.err (!%p4482_p2)
}
   0xb   :  { %s4486_s10 = scalar_lea.vmem %s33_s25, 35072  ;;  %p4491_p4 = scmp.lt.s32.totalorder %s33_s25, %s33_s25 }
   0xc   :  { %p4487_p3 = scmp.ne.s32.totalorder %s33_s25, %s4486_s10  ;;  %p4492_p5 = scmp.lt.s32.totalorder %s4486_s10, %s4486_s10 }
   0xe   :  { %p4493_p6 = por %p4492_p5, %p4491_p4 }
  0x10   :  { %p4494_p7 = pnand %p4493_p6, %p4487_p3 }
  0x12   :  { %4497 = shalt.err (!%p4494_p7)
}
  0x13   :  { %s4663_s11 = smov 256   ;;  %s4664_s12 = smov 16  }
  0x14   :  { %38 = dma.hbm_to_vmem [thread:$0]  %s4843_s1, 35072, %s33_s25, [#allocation6], %s4663_s11, %s4663_s11, %s4664_s12  }
  0x15   :  { %s4665_s15 = smov [#allocation8]   ;;  %s4498_s19 = scalar_lea.hbm %s4845_s3, 12288 }
  0x16   :  { %s54_s16 = sshll.u32 %s4665_s15, 4  ;;  %p4499_p8 = scmp.ne.s32.totalorder %s4845_s3, %s4498_s19  ;;  %s55_s16 = int_to_ptr.vmem [resolvable:$true] %s54_s16 }
  0x17   :  { %p4502_p9 = scmp.lt.u32.totalorder %s4498_s19, %s4845_s3 }
  0x19   :  { %p4504_p10 = pnand %p4502_p9, %p4499_p8 }
  0x1b   :  { %4507 = shalt.err (!%p4504_p10)
}
  0x1c   :  { %s4508_s24 = scalar_lea.vmem %s55_s16, 12288  ;;  %p4513_p12 = scmp.lt.s32.totalorder %s55_s16, %s55_s16 }
  0x1d   :  { %p4509_p11 = scmp.ne.s32.totalorder %s55_s16, %s4508_s24  ;;  %p4514_p13 = scmp.lt.s32.totalorder %s4508_s24, %s4508_s24 }
  0x1f   :  { %p4515_p0 = por %p4514_p13, %p4513_p12 }
  0x21   :  { %p4516_p1 = pnand %p4515_p0, %p4509_p11 }
  0x23   :  { %4519 = shalt.err (!%p4516_p1)
}
  0x24   :  { %s4666_s1 = smov 192   ;;  %s4667_s25 = smov 12  }
  0x25   :  { %60 = dma.hbm_to_vmem [thread:$0]  %s4845_s3, 12288, %s55_s16, [#allocation9], %s4666_s1, %s4666_s1, %s4667_s25  }
  0x26   :  { %s4668_s28 = smov [#allocation11]   ;;  %s4520_s9 = scalar_lea.hbm %s4847_s5, 3072 }
  0x27   :  { %s76_s29 = sshll.u32 %s4668_s28, 4  ;;  %p4521_p2 = scmp.ne.s32.totalorder %s4847_s5, %s4520_s9  ;;  %s77_s29 = int_to_ptr.vmem [resolvable:$true] %s76_s29 }
  0x28   :  { %p4524_p3 = scmp.lt.u32.totalorder %s4520_s9, %s4847_s5 }
  0x2a   :  { %p4526_p4 = pnand %p4524_p3, %p4521_p2 }
  0x2c   :  { %4529 = shalt.err (!%p4526_p4)
}
  0x2d   :  { %s4530_s14 = scalar_lea.vmem %s77_s29, 3072  ;;  %p4535_p6 = scmp.lt.s32.totalorder %s77_s29, %s77_s29 }
  0x2e   :  { %p4531_p5 = scmp.ne.s32.totalorder %s77_s29, %s4530_s14  ;;  %p4536_p7 = scmp.lt.s32.totalorder %s4530_s14, %s4530_s14 }
  0x30   :  { %p4537_p8 = por %p4536_p7, %p4535_p6 }
  0x32   :  { %p4538_p9 = pnand %p4537_p8, %p4531_p5 }
  0x34   :  { %4541 = shalt.err (!%p4538_p9)
}
  0x35   :  { %s4669_s3 = smov 64   ;;  %s4670_s15 = smov 4  }
  0x36   :  { %82 = dma.hbm_to_vmem [thread:$0]  %s4847_s5, 3072, %s77_s29, [#allocation12], %s4669_s3, %s4669_s3, %s4670_s15  }
  0x37   :  { %s4671_s18 = smov [#allocation2]   ;;  %s4672_s20 = smov [#allocation7]  }
  0x38   :  { %s23_s19 = sshll.u32 %s4671_s18, 4  ;;  %s45_s21 = sshll.u32 %s4672_s20, 4  ;;  %s24_s19 = int_to_ptr.vmem [resolvable:$true] %s23_s19  ;;  %s46_s21 = int_to_ptr.vmem [resolvable:$true] %s45_s21 }
  0x39   :  { %s4542_s24 = scalar_lea.hbm %s4842_s0, 1152 }
  0x3a   :  { %p4543_p10 = scmp.ne.s32.totalorder %s4842_s0, %s4542_s24  ;;  %p4546_p11 = scmp.lt.u32.totalorder %s4542_s24, %s4842_s0 }
  0x3c   :  { %p4548_p12 = pnand %p4546_p11, %p4543_p10 }
  0x3e   :  { %4551 = shalt.err (!%p4548_p12)
}
  0x3f   :  { %s4552_s5 = scalar_lea.vmem %s24_s19, 1152  ;;  %p4557_p0 = scmp.lt.s32.totalorder %s24_s19, %s24_s19 }
  0x40   :  { %p4553_p13 = scmp.ne.s32.totalorder %s24_s19, %s4552_s5  ;;  %p4558_p1 = scmp.lt.s32.totalorder %s4552_s5, %s4552_s5 }
  0x42   :  { %p4559_p2 = por %p4558_p1, %p4557_p0 }
  0x44   :  { %p4560_p3 = pnand %p4559_p2, %p4553_p13 }
  0x46   :  { %4563 = shalt.err (!%p4560_p3)
}
  0x47   :  { %26 = dma.hbm_to_vmem [thread:$0]  %s4842_s0, 1152, %s24_s19, [#allocation3]  }
  0x48   :  { %s4564_s9 = scalar_lea.hbm %s4844_s2, 64 }
  0x49   :  { %p4565_p4 = scmp.ne.s32.totalorder %s4844_s2, %s4564_s9  ;;  %p4568_p5 = scmp.lt.u32.totalorder %s4564_s9, %s4844_s2 }
  0x4b   :  { %p4570_p6 = pnand %p4568_p5, %p4565_p4 }
  0x4d   :  { %4573 = shalt.err (!%p4570_p6)
}
  0x4e   :  { %s4574_s14 = scalar_lea.vmem %s46_s21, 64  ;;  %p4579_p8 = scmp.lt.s32.totalorder %s46_s21, %s46_s21 }
  0x4f   :  { %p4575_p7 = scmp.ne.s32.totalorder %s46_s21, %s4574_s14  ;;  %p4580_p9 = scmp.lt.s32.totalorder %s4574_s14, %s4574_s14 }
  0x51   :  { %p4581_p10 = por %p4580_p9, %p4579_p8 }
  0x53   :  { %p4582_p11 = pnand %p4581_p10, %p4575_p7 }
  0x55   :  { %4585 = shalt.err (!%p4582_p11)
}
  0x56   :  { %48 = dma.hbm_to_vmem [thread:$0]  %s4844_s2, 64, %s46_s21, [#allocation6]  }
  0x57   :  { %s4673_s15 = smov [#allocation10]   ;;  %s4674_s17 = smov [#allocation13]  }
  0x58   :  { %s67_s16 = sshll.u32 %s4673_s15, 4  ;;  %s89_s18 = sshll.u32 %s4674_s17, 4  ;;  %s68_s16 = int_to_ptr.vmem [resolvable:$true] %s67_s16  ;;  %s90_s18 = int_to_ptr.vmem [resolvable:$true] %s89_s18 }
  0x59   :  { %s4586_s22 = scalar_lea.hbm %s4846_s4, 48 }
  0x5a   :  { %p4587_p12 = scmp.ne.s32.totalorder %s4846_s4, %s4586_s22  ;;  %p4590_p13 = scmp.lt.u32.totalorder %s4586_s22, %s4846_s4 }
  0x5c   :  { %p4592_p0 = pnand %p4590_p13, %p4587_p12 }
  0x5e   :  { %4595 = shalt.err (!%p4592_p0)
}
  0x5f   :  { %s4596_s2 = scalar_lea.vmem %s68_s16, 48  ;;  %s4600_s21 = scalar_lea.vmem %s68_s16, 64 }
  0x60   :  { %p4597_p1 = scmp.ne.s32.totalorder %s68_s16, %s4596_s2  ;;  %p4601_p2 = scmp.lt.s32.totalorder %s68_s16, %s68_s16 }
  0x61   :  { %p4602_p3 = scmp.lt.s32.totalorder %s4600_s21, %s4596_s2 }
  0x63   :  { %p4603_p4 = por %p4602_p3, %p4601_p2 }
  0x65   :  { %p4604_p5 = pnand %p4603_p4, %p4597_p1 }
  0x67   :  { %4607 = shalt.err (!%p4604_p5)
}
  0x68   :  { %70 = dma.hbm_to_vmem [thread:$0]  %s4846_s4, 48, %s68_s16, [#allocation9]  }
  0x69   :  { %s4608_s29 = scalar_lea.hbm %s4848_s6, 16 }
  0x6a   :  { %p4609_p6 = scmp.ne.s32.totalorder %s4848_s6, %s4608_s29  ;;  %p4612_p7 = scmp.lt.u32.totalorder %s4608_s29, %s4848_s6 }
  0x6c   :  { %p4614_p8 = pnand %p4612_p7, %p4609_p6 }
  0x6e   :  { %4617 = shalt.err (!%p4614_p8)
}
  0x6f   :  { %s4618_s11 = scalar_lea.vmem %s90_s18, 16  ;;  %s4622_s12 = scalar_lea.vmem %s90_s18, 32 }
  0x70   :  { %p4619_p9 = scmp.ne.s32.totalorder %s90_s18, %s4618_s11  ;;  %p4623_p10 = scmp.lt.s32.totalorder %s90_s18, %s90_s18 }
  0x71   :  { %p4624_p11 = scmp.lt.s32.totalorder %s4622_s12, %s4618_s11 }
  0x73   :  { %p4625_p12 = por %p4624_p11, %p4623_p10 }
  0x75   :  { %p4626_p13 = pnand %p4625_p12, %p4619_p9 }
  0x77   :  { %4629 = shalt.err (!%p4626_p13)
}
  0x78   :  { %92 = dma.hbm_to_vmem [thread:$0]  %s4848_s6, 16, %s90_s18, [#allocation12]  }
  0x79   :  { %4652 = dma.done.wait [#allocation3], 1152  }
  0x7a   :  { %4653 = vsyncadd [#allocation3], 4294966144 }
  0x7b   :  { %4654 = dma.done.wait [#allocation6], 35136  }
  0x7c   :  { %4655 = vsyncadd [#allocation6], 4294932160 }
  0x7d   :  { %4656 = dma.done.wait [#allocation9], 12336  }
  0x7e   :  { %4657 = vsyncadd [#allocation9], 4294954960 }
  0x7f   :  { %4658 = dma.done.wait [#allocation12], 3088  }
  0x80   :  { %4659 = vsyncadd [#allocation12], 4294964208  ;;  %v3912_v0 = vld [vmem:[#allocation5 + $0x4] ss:$16 sps:$4 sm:$0xff]   ;;  %v3914_v1 = vld [vmem:[#allocation5 + $0xc] ss:$16 sps:$4 sm:$0xff]  }
  0x81   :  { %1816 = vmatprep.subr.bf16.mxu0 %v3912_v0  ;;  %v3916_v2 = vld [vmem:[#allocation5] ss:$16 sps:$4 sm:$0xff]   ;;  %v3917_v3 = vld [vmem:[#allocation5 + $0x8] ss:$16 sps:$4 sm:$0xff]   ;;  %2021 = vmatprep.subr.bf16.mxu1 %v3914_v1  ;;  %v3918_v4 = vld [vmem:[#allocation5 + $0x24] ss:$16 sps:$4 sm:$0xff]  }
  0x82   :  { %1817 = vmatpush1.bf16.msra.mxu0 %v3916_v2  ;;  %2022 = vmatpush1.bf16.msra.mxu1 %v3917_v3  ;;  %v3920_v5 = vld [vmem:[#allocation5 + $0x2c] ss:$16 sps:$4 sm:$0xff]   ;;  %v3922_v6 = vld [vmem:[#allocation5 + $0x20] ss:$16 sps:$4 sm:$0xff]   ;;  %v3923_v7 = vld [vmem:[#allocation5 + $0x28] ss:$16 sps:$4 sm:$0xff]  }
  0x83   :  { %1818 = vmatprep.subr.bf16.mxu0 %v3918_v4  ;;  %2023 = vmatprep.subr.bf16.mxu1 %v3920_v5  ;;  %v3924_v8 = vld [vmem:[#allocation5 + $0x44] ss:$16 sps:$4 sm:$0xff]   ;;  %v3926_v9 = vld [vmem:[#allocation5 + $0x4c] ss:$16 sps:$4 sm:$0xff]   ;;  %v3928_v10 = vld [vmem:[#allocation5 + $0x40] ss:$16 sps:$4 sm:$0xff]  }
  0x84   :  { %v3929_v11 = vld [vmem:[#allocation5 + $0x48] ss:$16 sps:$4 sm:$0xff]   ;;  %v3930_v12 = vld [vmem:[#allocation5 + $0x64] ss:$16 sps:$4 sm:$0xff]   ;;  %v3932_v13 = vld [vmem:[#allocation5 + $0x6c] ss:$16 sps:$4 sm:$0xff]  }
  0x85   :  { %v3934_v14 = vld [vmem:[#allocation5 + $0x60] ss:$16 sps:$4 sm:$0xff]   ;;  %v3935_v15 = vld [vmem:[#allocation5 + $0x68] ss:$16 sps:$4 sm:$0xff]   ;;  %v3936_v16 = vld [vmem:[#allocation5 + $0x84] ss:$16 sps:$4 sm:$0xff]  }
  0x86   :  { %1819 = vmatpush1.bf16.msra.mxu0 %v3922_v6  ;;  %2024 = vmatpush1.bf16.msra.mxu1 %v3923_v7  ;;  %v3938_v17 = vld [vmem:[#allocation5 + $0x8c] ss:$16 sps:$4 sm:$0xff]   ;;  %v3940_v18 = vld [vmem:[#allocation5 + $0x80] ss:$16 sps:$4 sm:$0xff]   ;;  %v3941_v19 = vld [vmem:[#allocation5 + $0x88] ss:$16 sps:$4 sm:$0xff]  }
  0x87   :  { %1820 = vmatprep.subr.bf16.mxu0 %v3924_v8  ;;  %2025 = vmatprep.subr.bf16.mxu1 %v3926_v9  ;;  %v3942_v20 = vld [vmem:[#allocation5 + $0xa4] ss:$16 sps:$4 sm:$0xff]   ;;  %v3944_v21 = vld [vmem:[#allocation5 + $0xac] ss:$16 sps:$4 sm:$0xff]   ;;  %v3946_v22 = vld [vmem:[#allocation5 + $0xa0] ss:$16 sps:$4 sm:$0xff]  }
  0x88   :  { %v3947_v23 = vld [vmem:[#allocation5 + $0xa8] ss:$16 sps:$4 sm:$0xff]   ;;  %v3948_v24 = vld [vmem:[#allocation5 + $0xc4] ss:$16 sps:$4 sm:$0xff]   ;;  %v3950_v25 = vld [vmem:[#allocation5 + $0xcc] ss:$16 sps:$4 sm:$0xff]  }
  0x89   :  { %v3952_v26 = vld [vmem:[#allocation5 + $0xc0] ss:$16 sps:$4 sm:$0xff]   ;;  %v3953_v27 = vld [vmem:[#allocation5 + $0xc8] ss:$16 sps:$4 sm:$0xff]   ;;  %v3954_v28 = vld [vmem:[#allocation5 + $0xe4] ss:$16 sps:$4 sm:$0xff]  }
  0x8a   :  { %1821 = vmatpush1.bf16.msra.mxu0 %v3928_v10  ;;  %2026 = vmatpush1.bf16.msra.mxu1 %v3929_v11  ;;  %v3956_v29 = vld [vmem:[#allocation5 + $0xec] ss:$16 sps:$4 sm:$0xff]   ;;  %v3958_v30 = vld [vmem:[#allocation5 + $0xe0] ss:$16 sps:$4 sm:$0xff]   ;;  %v3959_v31 = vld [vmem:[#allocation5 + $0xe8] ss:$16 sps:$4 sm:$0xff]  }
  0x8b   :  { %1822 = vmatprep.subr.bf16.mxu0 %v3930_v12  ;;  %2027 = vmatprep.subr.bf16.mxu1 %v3932_v13  ;;  %v3960_v32 = vld [vmem:[#allocation5 + $0x104] ss:$16 sps:$4 sm:$0xff]   ;;  %v3962_v33 = vld [vmem:[#allocation5 + $0x10c] ss:$16 sps:$4 sm:$0xff]   ;;  %v3964_v34 = vld [vmem:[#allocation5 + $0x100] ss:$16 sps:$4 sm:$0xff]  }
  0x8c   :  { %v3965_v35 = vld [vmem:[#allocation5 + $0x108] ss:$16 sps:$4 sm:$0xff]   ;;  %v3966_v36 = vld [vmem:[#allocation5 + $0x124] ss:$16 sps:$4 sm:$0xff]   ;;  %v3968_v37 = vld [vmem:[#allocation5 + $0x12c] ss:$16 sps:$4 sm:$0xff]  }
  0x8d   :  { %v3970_v38 = vld [vmem:[#allocation5 + $0x120] ss:$16 sps:$4 sm:$0xff]   ;;  %v3971_v39 = vld [vmem:[#allocation5 + $0x128] ss:$16 sps:$4 sm:$0xff]   ;;  %v3972_v40 = vld [vmem:[#allocation5 + $0x144] ss:$16 sps:$4 sm:$0xff]  }
  0x8e   :  { %1823 = vmatpush1.bf16.msra.mxu0 %v3934_v14  ;;  %2028 = vmatpush1.bf16.msra.mxu1 %v3935_v15  ;;  %v3974_v41 = vld [vmem:[#allocation5 + $0x14c] ss:$16 sps:$4 sm:$0xff]   ;;  %v3976_v42 = vld [vmem:[#allocation5 + $0x140] ss:$16 sps:$4 sm:$0xff]   ;;  %v3977_v43 = vld [vmem:[#allocation5 + $0x148] ss:$16 sps:$4 sm:$0xff]  }
  0x8f   :  { %1824 = vmatprep.subr.bf16.mxu0 %v3936_v16  ;;  %2029 = vmatprep.subr.bf16.mxu1 %v3938_v17  ;;  %v3978_v44 = vld [vmem:[#allocation5 + $0x164] ss:$16 sps:$4 sm:$0xff]   ;;  %v3980_v45 = vld [vmem:[#allocation5 + $0x16c] ss:$16 sps:$4 sm:$0xff]   ;;  %v3982_v47 = vld [vmem:[#allocation5 + $0x160] ss:$16 sps:$4 sm:$0xff]  }
  0x90   :  { %v116_v46 = vld [vmem:[#allocation2 + $0x8] sm:$0xff]  ;;  %v3983_v49 = vld [vmem:[#allocation5 + $0x168] ss:$16 sps:$4 sm:$0xff]   ;;  %v3986_v51 = vld [vmem:[#allocation5 + $0x18c] ss:$16 sps:$4 sm:$0xff]   ;;  %vm1803_vm0 = vcmask 1043456  }
  0x91   :  { %v125_v48 = vpack.c.bf16 %v116_v46, %v116_v46  ;;  %v3984_v50 = vld [vmem:[#allocation5 + $0x184] ss:$16 sps:$4 sm:$0xff]   ;;  %v3988_v52 = vld [vmem:[#allocation5 + $0x180] ss:$16 sps:$4 sm:$0xff]   ;;  %v3989_v53 = vld [vmem:[#allocation5 + $0x188] ss:$16 sps:$4 sm:$0xff]  }
  0x92   :  { %1825 = vmatpush1.bf16.msra.mxu0 %v3940_v18  ;;  %2030 = vmatpush1.bf16.msra.mxu1 %v3941_v19  ;;  %v3990_v54 = vld [vmem:[#allocation5 + $0x1a4] ss:$16 sps:$4 sm:$0xff]   ;;  %v3992_v55 = vld [vmem:[#allocation5 + $0x1ac] ss:$16 sps:$4 sm:$0xff]   ;;  %v3994_v56 = vld [vmem:[#allocation5 + $0x1a0] ss:$16 sps:$4 sm:$0xff]  }
  0x93   :  { %1826 = vmatprep.subr.bf16.mxu0 %v3942_v20  ;;  %2031 = vmatprep.subr.bf16.mxu1 %v3944_v21  ;;  %v3995_v57 = vld [vmem:[#allocation5 + $0x1a8] ss:$16 sps:$4 sm:$0xff]   ;;  %v3996_v58 = vld [vmem:[#allocation5 + $0x1c4] ss:$16 sps:$4 sm:$0xff]   ;;  %v3998_v59 = vld [vmem:[#allocation5 + $0x1cc] ss:$16 sps:$4 sm:$0xff]  }
  0x94   :  { %1848 = vmatprep.mubr.bf16.mxu0 %v125_v48  ;;  %2053 = vmatprep.mubr.bf16.mxu1 %v125_v48  ;;  %v4000_v60 = vld [vmem:[#allocation5 + $0x1c0] ss:$16 sps:$4 sm:$0xff]   ;;  %v4001_v61 = vld [vmem:[#allocation5 + $0x1c8] ss:$16 sps:$4 sm:$0xff]   ;;  %v4002_v62 = vld [vmem:[#allocation5 + $0x1e4] ss:$16 sps:$4 sm:$0xff]  }
  0x95   :  { %v4004_v63 = vld [vmem:[#allocation5 + $0x1ec] ss:$16 sps:$4 sm:$0xff]   ;;  %v4006_v0 = vld [vmem:[#allocation5 + $0x1e0] ss:$16 sps:$4 sm:$0xff]   ;;  %v4007_v1 = vld [vmem:[#allocation5 + $0x1e8] ss:$16 sps:$4 sm:$0xff]  }
  0x96   :  { %1827 = vmatpush1.bf16.msra.mxu0 %v3946_v22  ;;  %2032 = vmatpush1.bf16.msra.mxu1 %v3947_v23  ;;  %v115_v2 = vld [vmem:[#allocation2] sm:$0xff]  ;;  %v4010_v3 = vld [vmem:[#allocation5 + $0x204] ss:$16 sps:$4 sm:$0xff]   ;;  %v4008_v6 = vld [vmem:[#allocation5 + $0x200] ss:$16 sps:$4 sm:$0xff]   ;;  %vm1799_vm1 = vcmask 588800  }
  0x97   :  { %1828 = vmatprep.subr.bf16.mxu0 %v3948_v24  ;;  %2033 = vmatprep.subr.bf16.mxu1 %v3950_v25  ;;  %v4013_v4 = vld [vmem:[#allocation5 + $0x20c] ss:$16 sps:$4 sm:$0xff]   ;;  %v124_v5 = vpack.c.bf16 %v115_v2, %v115_v2  ;;  %v4011_v7 = vld [vmem:[#allocation5 + $0x208] ss:$16 sps:$4 sm:$0xff]   ;;  %v4016_v8 = vld [vmem:[#allocation5 + $0x224] ss:$16 sps:$4 sm:$0xff]  }
  0x98   :  { %v4019_v9 = vld [vmem:[#allocation5 + $0x22c] ss:$16 sps:$4 sm:$0xff]   ;;  %v4014_v10 = vld [vmem:[#allocation5 + $0x220] ss:$16 sps:$4 sm:$0xff]   ;;  %v4017_v11 = vld [vmem:[#allocation5 + $0x228] ss:$16 sps:$4 sm:$0xff]  }
  0x99   :  { %v4022_v12 = vld [vmem:[#allocation5 + $0x244] ss:$16 sps:$4 sm:$0xff]   ;;  %v4025_v13 = vld [vmem:[#allocation5 + $0x24c] ss:$16 sps:$4 sm:$0xff]   ;;  %v4020_v14 = vld [vmem:[#allocation5 + $0x240] ss:$16 sps:$4 sm:$0xff]  }
  0x9a   :  { %1829 = vmatpush1.bf16.msra.mxu0 %v3952_v26  ;;  %2034 = vmatpush1.bf16.msra.mxu1 %v3953_v27  ;;  %v4023_v15 = vld [vmem:[#allocation5 + $0x248] ss:$16 sps:$4 sm:$0xff]   ;;  %v4028_v16 = vld [vmem:[#allocation5 + $0x264] ss:$16 sps:$4 sm:$0xff]   ;;  %v4031_v17 = vld [vmem:[#allocation5 + $0x26c] ss:$16 sps:$4 sm:$0xff]  }
  0x9b   :  { %1830 = vmatprep.subr.bf16.mxu0 %v3954_v28  ;;  %2035 = vmatprep.subr.bf16.mxu1 %v3956_v29  ;;  %v4026_v18 = vld [vmem:[#allocation5 + $0x260] ss:$16 sps:$4 sm:$0xff]   ;;  %v4029_v19 = vld [vmem:[#allocation5 + $0x268] ss:$16 sps:$4 sm:$0xff]   ;;  %v4034_v20 = vld [vmem:[#allocation5 + $0x284] ss:$16 sps:$4 sm:$0xff]  }
  0x9c   :  { %v4037_v21 = vld [vmem:[#allocation5 + $0x28c] ss:$16 sps:$4 sm:$0xff]   ;;  %v4032_v22 = vld [vmem:[#allocation5 + $0x280] ss:$16 sps:$4 sm:$0xff]   ;;  %v4035_v23 = vld [vmem:[#allocation5 + $0x288] ss:$16 sps:$4 sm:$0xff]  }
  0x9d   :  { %v4040_v24 = vld [vmem:[#allocation5 + $0x2a4] ss:$16 sps:$4 sm:$0xff]   ;;  %v4043_v25 = vld [vmem:[#allocation5 + $0x2ac] ss:$16 sps:$4 sm:$0xff]   ;;  %v4038_v26 = vld [vmem:[#allocation5 + $0x2a0] ss:$16 sps:$4 sm:$0xff]  }
  0x9e   :  { %1831 = vmatpush1.bf16.msra.mxu0 %v3958_v30  ;;  %2036 = vmatpush1.bf16.msra.mxu1 %v3959_v31  ;;  %v4041_v27 = vld [vmem:[#allocation5 + $0x2a8] ss:$16 sps:$4 sm:$0xff]   ;;  %v4046_v28 = vld [vmem:[#allocation5 + $0x2c4] ss:$16 sps:$4 sm:$0xff]   ;;  %v4049_v29 = vld [vmem:[#allocation5 + $0x2cc] ss:$16 sps:$4 sm:$0xff]  }
  0x9f   :  { %1832 = vmatprep.subr.bf16.mxu0 %v3960_v32  ;;  %2037 = vmatprep.subr.bf16.mxu1 %v3962_v33  ;;  %v118_v30 = vld [vmem:[#allocation2 + $0x18] sm:$0xff]  ;;  %v4047_v33 = vld [vmem:[#allocation5 + $0x2c8] ss:$16 sps:$4 sm:$0xff]   ;;  %vm4677_vm2 = vmmov 0   ;;  %s4678_s6 = smov [#allocation14]  }
  0xa0   :  { %v4044_v31 = vld [vmem:[#allocation5 + $0x2c0] ss:$16 sps:$4 sm:$0xff]   ;;  %v127_v32 = vpack.c.bf16 %v118_v30, %v118_v30  ;;  %v4070_v46 = vld [vmem:[#allocation5 + $0x344] ss:$16 sps:$4 sm:$0xff]   ;;  %s3345_s14 = sshll.u32 %s4678_s6, 4  ;;  %s3346_s14 = int_to_ptr.vmem [resolvable:$true] %s3345_s14 }
  0xa1   :  { %v4068_v48 = vld [vmem:[#allocation5 + $0x340] ss:$16 sps:$4 sm:$0xff]   ;;  %v4100_v2 = vld [vmem:[#allocation5 + $0x3e4] ss:$16 sps:$4 sm:$0xff]   ;;  %s4630_s0 = scalar_lea.vmem %s3346_s14, 128  ;;  %p4635_p1 = scmp.lt.s32.totalorder %s3346_s14, %s3346_s14 }
  0xa2   :  { %1833 = vmatpush1.bf16.msra.mxu0 %v3964_v34  ;;  %2038 = vmatpush1.bf16.msra.mxu1 %v3965_v35  ;;  %v4052_v34 = vld [vmem:[#allocation5 + $0x2e4] ss:$16 sps:$4 sm:$0xff]   ;;  %v4055_v35 = vld [vmem:[#allocation5 + $0x2ec] ss:$16 sps:$4 sm:$0xff]   ;;  %p4631_p0 = scmp.ne.s32.totalorder %s3346_s14, %s4630_s0  ;;  %p4636_p2 = scmp.lt.s32.totalorder %s4630_s0, %s4630_s0 }
  0xa3   :  { %1834 = vmatprep.subr.bf16.mxu0 %v3966_v36  ;;  %2039 = vmatprep.subr.bf16.mxu1 %v3968_v37  ;;  %v4050_v36 = vld [vmem:[#allocation5 + $0x2e0] ss:$16 sps:$4 sm:$0xff]   ;;  %v4053_v37 = vld [vmem:[#allocation5 + $0x2e8] ss:$16 sps:$4 sm:$0xff]   ;;  %v4136_v30 = vld [vmem:[#allocation5 + $0x4a4] ss:$16 sps:$4 sm:$0xff]  }
  0xa4   :  { %p4637_p3 = por %p4636_p2, %p4635_p1 }
  0xa6   :  { %1835 = vmatpush1.bf16.msra.mxu0 %v3970_v38  ;;  %2040 = vmatpush1.bf16.msra.mxu1 %v3971_v39  ;;  %v4058_v38 = vld [vmem:[#allocation5 + $0x304] ss:$16 sps:$4 sm:$0xff]   ;;  %v4061_v39 = vld [vmem:[#allocation5 + $0x30c] ss:$16 sps:$4 sm:$0xff]   ;;  %p4638_p4 = pnand %p4637_p3, %p4631_p0 }
  0xa7   :  { %1836 = vmatprep.subr.bf16.mxu0 %v3972_v40  ;;  %2041 = vmatprep.subr.bf16.mxu1 %v3974_v41  ;;  %v4056_v40 = vld [vmem:[#allocation5 + $0x300] ss:$16 sps:$4 sm:$0xff]   ;;  %v4059_v41 = vld [vmem:[#allocation5 + $0x308] ss:$16 sps:$4 sm:$0xff]  }
  0xaa   :  { %1837 = vmatpush1.bf16.msra.mxu0 %v3976_v42  ;;  %2042 = vmatpush1.bf16.msra.mxu1 %v3977_v43  ;;  %v4064_v42 = vld [vmem:[#allocation5 + $0x324] ss:$16 sps:$4 sm:$0xff]   ;;  %v4067_v43 = vld [vmem:[#allocation5 + $0x32c] ss:$16 sps:$4 sm:$0xff]  }
  0xab   :  { %1838 = vmatprep.subr.bf16.mxu0 %v3978_v44  ;;  %2043 = vmatprep.subr.bf16.mxu1 %v3980_v45  ;;  %v4062_v44 = vld [vmem:[#allocation5 + $0x320] ss:$16 sps:$4 sm:$0xff]   ;;  %v4065_v45 = vld [vmem:[#allocation5 + $0x328] ss:$16 sps:$4 sm:$0xff]  }
  0xae   :  { %1839 = vmatpush1.bf16.msra.mxu0 %v3982_v47  ;;  %2044 = vmatpush1.bf16.msra.mxu1 %v3983_v49  ;;  %v4073_v47 = vld [vmem:[#allocation5 + $0x34c] ss:$16 sps:$4 sm:$0xff]   ;;  %v4071_v49 = vld [vmem:[#allocation5 + $0x348] ss:$16 sps:$4 sm:$0xff]  }
  0xaf   :  { %1840 = vmatprep.subr.bf16.mxu0 %v3984_v50  ;;  %2045 = vmatprep.subr.bf16.mxu1 %v3986_v51  ;;  %v4076_v50 = vld [vmem:[#allocation5 + $0x364] ss:$16 sps:$4 sm:$0xff]   ;;  %v4079_v51 = vld [vmem:[#allocation5 + $0x36c] ss:$16 sps:$4 sm:$0xff]  }
  0xb2   :  { %1841 = vmatpush1.bf16.msra.mxu0 %v3988_v52  ;;  %2046 = vmatpush1.bf16.msra.mxu1 %v3989_v53  ;;  %v4074_v52 = vld [vmem:[#allocation5 + $0x360] ss:$16 sps:$4 sm:$0xff]   ;;  %v4077_v53 = vld [vmem:[#allocation5 + $0x368] ss:$16 sps:$4 sm:$0xff]  }
  0xb3   :  { %1842 = vmatprep.subr.bf16.mxu0 %v3990_v54  ;;  %2047 = vmatprep.subr.bf16.mxu1 %v3992_v55  ;;  %v4082_v54 = vld [vmem:[#allocation5 + $0x384] ss:$16 sps:$4 sm:$0xff]   ;;  %v4085_v55 = vld [vmem:[#allocation5 + $0x38c] ss:$16 sps:$4 sm:$0xff]  }
  0xb6   :  { %1843 = vmatpush1.bf16.msra.mxu0 %v3994_v56  ;;  %2048 = vmatpush1.bf16.msra.mxu1 %v3995_v57  ;;  %v4080_v56 = vld [vmem:[#allocation5 + $0x380] ss:$16 sps:$4 sm:$0xff]   ;;  %v4083_v57 = vld [vmem:[#allocation5 + $0x388] ss:$16 sps:$4 sm:$0xff]  }
  0xb7   :  { %1844 = vmatprep.subr.bf16.mxu0 %v3996_v58  ;;  %2049 = vmatprep.subr.bf16.mxu1 %v3998_v59  ;;  %v4088_v58 = vld [vmem:[#allocation5 + $0x3a4] ss:$16 sps:$4 sm:$0xff]   ;;  %v4091_v59 = vld [vmem:[#allocation5 + $0x3ac] ss:$16 sps:$4 sm:$0xff]  }
  0xba   :  { %1845 = vmatpush1.bf16.msra.mxu0 %v4000_v60  ;;  %2050 = vmatpush1.bf16.msra.mxu1 %v4001_v61  ;;  %v4086_v60 = vld [vmem:[#allocation5 + $0x3a0] ss:$16 sps:$4 sm:$0xff]   ;;  %v4089_v61 = vld [vmem:[#allocation5 + $0x3a8] ss:$16 sps:$4 sm:$0xff]  }
  0xbb   :  { %1846 = vmatprep.subr.bf16.mxu0 %v4002_v62  ;;  %2051 = vmatprep.subr.bf16.mxu1 %v4004_v63  ;;  %v4094_v62 = vld [vmem:[#allocation5 + $0x3c4] ss:$16 sps:$4 sm:$0xff]   ;;  %v4097_v63 = vld [vmem:[#allocation5 + $0x3cc] ss:$16 sps:$4 sm:$0xff]  }
  0xbe   :  { %1847 = vmatpush1.bf16.msra.mxu0 %v4006_v0  ;;  %2052 = vmatpush1.bf16.msra.mxu1 %v4007_v1  ;;  %v4092_v0 = vld [vmem:[#allocation5 + $0x3c0] ss:$16 sps:$4 sm:$0xff]   ;;  %v4095_v1 = vld [vmem:[#allocation5 + $0x3c8] ss:$16 sps:$4 sm:$0xff]  }
  0xbf   :  { %1857 = vmatprep.subr.bf16.mxu0 %v4010_v3  ;;  %2062 = vmatprep.subr.bf16.mxu1 %v4013_v4  ;;  %v4103_v3 = vld [vmem:[#allocation5 + $0x3ec] ss:$16 sps:$4 sm:$0xff]   ;;  %v4098_v4 = vld [vmem:[#allocation5 + $0x3e0] ss:$16 sps:$4 sm:$0xff]  }
  0xc1   :  { %1849 = vmatmul.mubr.bf16.vlgmr.msra.gmra.mrb[0].mxu0 %v124_v5  ;;  %2054 = vmatmul.mubr.bf16.vlgmr.msra.gmra.mrb[0].mxu1 %v124_v5  ;;  %v4101_v5 = vld [vmem:[#allocation5 + $0x3e8] ss:$16 sps:$4 sm:$0xff]  }
  0xc2   :  { %1858 = vmatpush1.bf16.msra.mxu0 %v4008_v6  ;;  %2063 = vmatpush1.bf16.msra.mxu1 %v4011_v7  ;;  %v4106_v6 = vld [vmem:[#allocation5 + $0x404] ss:$16 sps:$4 sm:$0xff]   ;;  %v117_v7 = vld [vmem:[#allocation2 + $0x10] sm:$0xff] }
  0xc3   :  { %1859 = vmatprep.subr.bf16.mxu0 %v4016_v8  ;;  %2064 = vmatprep.subr.bf16.mxu1 %v4019_v9  ;;  %v4109_v8 = vld [vmem:[#allocation5 + $0x40c] ss:$16 sps:$4 sm:$0xff]   ;;  %v4104_v9 = vld [vmem:[#allocation5 + $0x400] ss:$16 sps:$4 sm:$0xff]  }
  0xc4   :  { %1889 = vmatprep.mubr.bf16.mxu0 %v127_v32  ;;  %2094 = vmatprep.mubr.bf16.mxu1 %v127_v32  ;;  %v4134_v32 = vld [vmem:[#allocation5 + $0x4a0] ss:$16 sps:$4 sm:$0xff]  }
  0xc6   :  { %1860 = vmatpush1.bf16.msra.mxu0 %v4014_v10  ;;  %2065 = vmatpush1.bf16.msra.mxu1 %v4017_v11  ;;  %v4107_v10 = vld [vmem:[#allocation5 + $0x408] ss:$16 sps:$4 sm:$0xff]   ;;  %v126_v11 = vpack.c.bf16 %v117_v7, %v117_v7  ;;  %v4199_v7 = vld [vmem:[#allocation5 + $0x5ec] ss:$16 sps:$4 sm:$0xff]  }
  0xc7   :  { %1861 = vmatprep.subr.bf16.mxu0 %v4022_v12  ;;  %2066 = vmatprep.subr.bf16.mxu1 %v4025_v13  ;;  %v4112_v12 = vld [vmem:[#allocation5 + $0x424] ss:$16 sps:$4 sm:$0xff]   ;;  %v4115_v13 = vld [vmem:[#allocation5 + $0x42c] ss:$16 sps:$4 sm:$0xff]  }
  0xca   :  { %1862 = vmatpush1.bf16.msra.mxu0 %v4020_v14  ;;  %2067 = vmatpush1.bf16.msra.mxu1 %v4023_v15  ;;  %v120_v14 = vld [vmem:[#allocation2 + $0x28] sm:$0xff] }
  0xcb   :  { %1863 = vmatprep.subr.bf16.mxu0 %v4028_v16  ;;  %2068 = vmatprep.subr.bf16.mxu1 %v4031_v17  ;;  %v129_v15 = vpack.c.bf16 %v120_v14, %v120_v14  ;;  %v4110_v16 = vld [vmem:[#allocation5 + $0x420] ss:$16 sps:$4 sm:$0xff]   ;;  %v4113_v17 = vld [vmem:[#allocation5 + $0x428] ss:$16 sps:$4 sm:$0xff]  }
  0xce   :  { %1864 = vmatpush1.bf16.msra.mxu0 %v4026_v18  ;;  %2069 = vmatpush1.bf16.msra.mxu1 %v4029_v19  ;;  %v4118_v18 = vld [vmem:[#allocation5 + $0x444] ss:$16 sps:$4 sm:$0xff]   ;;  %v4121_v19 = vld [vmem:[#allocation5 + $0x44c] ss:$16 sps:$4 sm:$0xff]  }
  0xcf   :  { %1865 = vmatprep.subr.bf16.mxu0 %v4034_v20  ;;  %2070 = vmatprep.subr.bf16.mxu1 %v4037_v21  ;;  %v4116_v20 = vld [vmem:[#allocation5 + $0x440] ss:$16 sps:$4 sm:$0xff]   ;;  %v4119_v21 = vld [vmem:[#allocation5 + $0x448] ss:$16 sps:$4 sm:$0xff]  }
  0xd2   :  { %1866 = vmatpush1.bf16.msra.mxu0 %v4032_v22  ;;  %2071 = vmatpush1.bf16.msra.mxu1 %v4035_v23  ;;  %v4124_v22 = vld [vmem:[#allocation5 + $0x464] ss:$16 sps:$4 sm:$0xff]   ;;  %v4127_v23 = vld [vmem:[#allocation5 + $0x46c] ss:$16 sps:$4 sm:$0xff]  }
  0xd3   :  { %1867 = vmatprep.subr.bf16.mxu0 %v4040_v24  ;;  %2072 = vmatprep.subr.bf16.mxu1 %v4043_v25  ;;  %v4122_v24 = vld [vmem:[#allocation5 + $0x460] ss:$16 sps:$4 sm:$0xff]   ;;  %v4125_v25 = vld [vmem:[#allocation5 + $0x468] ss:$16 sps:$4 sm:$0xff]  }
  0xd6   :  { %1868 = vmatpush1.bf16.msra.mxu0 %v4038_v26  ;;  %2073 = vmatpush1.bf16.msra.mxu1 %v4041_v27  ;;  %v4130_v26 = vld [vmem:[#allocation5 + $0x484] ss:$16 sps:$4 sm:$0xff]   ;;  %v4133_v27 = vld [vmem:[#allocation5 + $0x48c] ss:$16 sps:$4 sm:$0xff]  }
  0xd7   :  { %1869 = vmatprep.subr.bf16.mxu0 %v4046_v28  ;;  %2074 = vmatprep.subr.bf16.mxu1 %v4049_v29  ;;  %v4128_v28 = vld [vmem:[#allocation5 + $0x480] ss:$16 sps:$4 sm:$0xff]   ;;  %v4131_v29 = vld [vmem:[#allocation5 + $0x488] ss:$16 sps:$4 sm:$0xff]  }
  0xda   :  { %1870 = vmatpush1.bf16.msra.mxu0 %v4044_v31  ;;  %2075 = vmatpush1.bf16.msra.mxu1 %v4047_v33  ;;  %v4139_v31 = vld [vmem:[#allocation5 + $0x4ac] ss:$16 sps:$4 sm:$0xff]   ;;  %v4137_v33 = vld [vmem:[#allocation5 + $0x4a8] ss:$16 sps:$4 sm:$0xff]  }
  0xdb   :  { %1871 = vmatprep.subr.bf16.mxu0 %v4052_v34  ;;  %2076 = vmatprep.subr.bf16.mxu1 %v4055_v35  ;;  %v4142_v34 = vld [vmem:[#allocation5 + $0x4c4] ss:$16 sps:$4 sm:$0xff]   ;;  %v4145_v35 = vld [vmem:[#allocation5 + $0x4cc] ss:$16 sps:$4 sm:$0xff]  }
  0xde   :  { %1872 = vmatpush1.bf16.msra.mxu0 %v4050_v36  ;;  %2077 = vmatpush1.bf16.msra.mxu1 %v4053_v37  ;;  %v4140_v36 = vld [vmem:[#allocation5 + $0x4c0] ss:$16 sps:$4 sm:$0xff]   ;;  %v4143_v37 = vld [vmem:[#allocation5 + $0x4c8] ss:$16 sps:$4 sm:$0xff]  }
  0xdf   :  { %1873 = vmatprep.subr.bf16.mxu0 %v4058_v38  ;;  %2078 = vmatprep.subr.bf16.mxu1 %v4061_v39  ;;  %v4148_v38 = vld [vmem:[#allocation5 + $0x4e4] ss:$16 sps:$4 sm:$0xff]   ;;  %v4151_v39 = vld [vmem:[#allocation5 + $0x4ec] ss:$16 sps:$4 sm:$0xff]  }
  0xe2   :  { %1874 = vmatpush1.bf16.msra.mxu0 %v4056_v40  ;;  %2079 = vmatpush1.bf16.msra.mxu1 %v4059_v41  ;;  %v4146_v40 = vld [vmem:[#allocation5 + $0x4e0] ss:$16 sps:$4 sm:$0xff]   ;;  %v4149_v41 = vld [vmem:[#allocation5 + $0x4e8] ss:$16 sps:$4 sm:$0xff]  }
  0xe3   :  { %1875 = vmatprep.subr.bf16.mxu0 %v4064_v42  ;;  %2080 = vmatprep.subr.bf16.mxu1 %v4067_v43  ;;  %v4154_v42 = vld [vmem:[#allocation5 + $0x504] ss:$16 sps:$4 sm:$0xff]   ;;  %v4157_v43 = vld [vmem:[#allocation5 + $0x50c] ss:$16 sps:$4 sm:$0xff]  }
  0xe6   :  { %1876 = vmatpush1.bf16.msra.mxu0 %v4062_v44  ;;  %2081 = vmatpush1.bf16.msra.mxu1 %v4065_v45  ;;  %v4152_v44 = vld [vmem:[#allocation5 + $0x500] ss:$16 sps:$4 sm:$0xff]   ;;  %v4155_v45 = vld [vmem:[#allocation5 + $0x508] ss:$16 sps:$4 sm:$0xff]  }
  0xe7   :  { %1877 = vmatprep.subr.bf16.mxu0 %v4070_v46  ;;  %2082 = vmatprep.subr.bf16.mxu1 %v4073_v47  ;;  %v4160_v46 = vld [vmem:[#allocation5 + $0x524] ss:$16 sps:$4 sm:$0xff]   ;;  %v4163_v47 = vld [vmem:[#allocation5 + $0x52c] ss:$16 sps:$4 sm:$0xff]  }
  0xea   :  { %1878 = vmatpush1.bf16.msra.mxu0 %v4068_v48  ;;  %2083 = vmatpush1.bf16.msra.mxu1 %v4071_v49  ;;  %v4158_v48 = vld [vmem:[#allocation5 + $0x520] ss:$16 sps:$4 sm:$0xff]   ;;  %v4161_v49 = vld [vmem:[#allocation5 + $0x528] ss:$16 sps:$4 sm:$0xff]  }
  0xeb   :  { %1879 = vmatprep.subr.bf16.mxu0 %v4076_v50  ;;  %2084 = vmatprep.subr.bf16.mxu1 %v4079_v51  ;;  %v4166_v50 = vld [vmem:[#allocation5 + $0x544] ss:$16 sps:$4 sm:$0xff]   ;;  %v4169_v51 = vld [vmem:[#allocation5 + $0x54c] ss:$16 sps:$4 sm:$0xff]  }
  0xee   :  { %1880 = vmatpush1.bf16.msra.mxu0 %v4074_v52  ;;  %2085 = vmatpush1.bf16.msra.mxu1 %v4077_v53  ;;  %v4164_v52 = vld [vmem:[#allocation5 + $0x540] ss:$16 sps:$4 sm:$0xff]   ;;  %v4167_v53 = vld [vmem:[#allocation5 + $0x548] ss:$16 sps:$4 sm:$0xff]  }
  0xef   :  { %1881 = vmatprep.subr.bf16.mxu0 %v4082_v54  ;;  %2086 = vmatprep.subr.bf16.mxu1 %v4085_v55  ;;  %v4172_v54 = vld [vmem:[#allocation5 + $0x564] ss:$16 sps:$4 sm:$0xff]   ;;  %v4175_v55 = vld [vmem:[#allocation5 + $0x56c] ss:$16 sps:$4 sm:$0xff]  }
  0xf2   :  { %1882 = vmatpush1.bf16.msra.mxu0 %v4080_v56  ;;  %2087 = vmatpush1.bf16.msra.mxu1 %v4083_v57  ;;  %v4170_v56 = vld [vmem:[#allocation5 + $0x560] ss:$16 sps:$4 sm:$0xff]   ;;  %v4173_v57 = vld [vmem:[#allocation5 + $0x568] ss:$16 sps:$4 sm:$0xff]  }
  0xf3   :  { %1883 = vmatprep.subr.bf16.mxu0 %v4088_v58  ;;  %2088 = vmatprep.subr.bf16.mxu1 %v4091_v59  ;;  %v4178_v58 = vld [vmem:[#allocation5 + $0x584] ss:$16 sps:$4 sm:$0xff]   ;;  %v4181_v59 = vld [vmem:[#allocation5 + $0x58c] ss:$16 sps:$4 sm:$0xff]  }
  0xf6   :  { %1884 = vmatpush1.bf16.msra.mxu0 %v4086_v60  ;;  %2089 = vmatpush1.bf16.msra.mxu1 %v4089_v61  ;;  %v4176_v60 = vld [vmem:[#allocation5 + $0x580] ss:$16 sps:$4 sm:$0xff]   ;;  %v4179_v61 = vld [vmem:[#allocation5 + $0x588] ss:$16 sps:$4 sm:$0xff]  }
  0xf7   :  { %1885 = vmatprep.subr.bf16.mxu0 %v4094_v62  ;;  %2090 = vmatprep.subr.bf16.mxu1 %v4097_v63  ;;  %v4184_v62 = vld [vmem:[#allocation5 + $0x5a4] ss:$16 sps:$4 sm:$0xff]   ;;  %v4187_v63 = vld [vmem:[#allocation5 + $0x5ac] ss:$16 sps:$4 sm:$0xff]  }
  0xfa   :  { %1886 = vmatpush1.bf16.msra.mxu0 %v4092_v0  ;;  %2091 = vmatpush1.bf16.msra.mxu1 %v4095_v1  ;;  %v4182_v0 = vld [vmem:[#allocation5 + $0x5a0] ss:$16 sps:$4 sm:$0xff]   ;;  %v4185_v1 = vld [vmem:[#allocation5 + $0x5a8] ss:$16 sps:$4 sm:$0xff]  }
  0xfb   :  { %1887 = vmatprep.subr.bf16.mxu0 %v4100_v2  ;;  %2092 = vmatprep.subr.bf16.mxu1 %v4103_v3  ;;  %v4190_v2 = vld [vmem:[#allocation5 + $0x5c4] ss:$16 sps:$4 sm:$0xff]   ;;  %v4193_v3 = vld [vmem:[#allocation5 + $0x5cc] ss:$16 sps:$4 sm:$0xff]  }
  0xfe   :  { %1888 = vmatpush1.bf16.msra.mxu0 %v4098_v4  ;;  %2093 = vmatpush1.bf16.msra.mxu1 %v4101_v5  ;;  %v4188_v4 = vld [vmem:[#allocation5 + $0x5c0] ss:$16 sps:$4 sm:$0xff]   ;;  %v4191_v5 = vld [vmem:[#allocation5 + $0x5c8] ss:$16 sps:$4 sm:$0xff]  }
  0xff   :  { %1898 = vmatprep.subr.bf16.mxu0 %v4106_v6  ;;  %2103 = vmatprep.subr.bf16.mxu1 %v4109_v8  ;;  %v4196_v6 = vld [vmem:[#allocation5 + $0x5e4] ss:$16 sps:$4 sm:$0xff]   ;;  %v4194_v8 = vld [vmem:[#allocation5 + $0x5e0] ss:$16 sps:$4 sm:$0xff]  }
 0x101   :  { %1890 = vmatmul.mubr.bf16.vlgmr.msra.gmra.mrb[0].mxu0 %v126_v11  ;;  %2095 = vmatmul.mubr.bf16.vlgmr.msra.gmra.mrb[0].mxu1 %v126_v11  ;;  %v119_v11 = vld [vmem:[#allocation2 + $0x20] sm:$0xff] }
 0x102   :  { %1899 = vmatpush1.bf16.msra.mxu0 %v4104_v9  ;;  %2104 = vmatpush1.bf16.msra.mxu1 %v4107_v10  ;;  %v4197_v9 = vld [vmem:[#allocation5 + $0x5e8] ss:$16 sps:$4 sm:$0xff]   ;;  %v4202_v10 = vld [vmem:[#allocation5 + $0x604] ss:$16 sps:$4 sm:$0xff]   ;;  %v128_v14 = vpack.c.bf16 %v119_v11, %v119_v11  ;;  %v4295_v11 = vld [vmem:[#allocation5 + $0x7ec] ss:$16 sps:$4 sm:$0xff]  }
 0x103   :  { %1900 = vmatprep.subr.bf16.mxu0 %v4112_v12  ;;  %2105 = vmatprep.subr.bf16.mxu1 %v4115_v13  ;;  %v4205_v12 = vld [vmem:[#allocation5 + $0x60c] ss:$16 sps:$4 sm:$0xff]   ;;  %v4200_v13 = vld [vmem:[#allocation5 + $0x600] ss:$16 sps:$4 sm:$0xff]  }
 0x104   :  { %1930 = vmatprep.mubr.bf16.mxu0 %v129_v15  ;;  %2135 = vmatprep.mubr.bf16.mxu1 %v129_v15  ;;  %v122_v15 = vld [vmem:[#allocation2 + $0x38] sm:$0xff] }
 0x106   :  { %1901 = vmatpush1.bf16.msra.mxu0 %v4110_v16  ;;  %2106 = vmatpush1.bf16.msra.mxu1 %v4113_v17  ;;  %v4203_v16 = vld [vmem:[#allocation5 + $0x608] ss:$16 sps:$4 sm:$0xff]   ;;  %v4208_v17 = vld [vmem:[#allocation5 + $0x624] ss:$16 sps:$4 sm:$0xff]  }
 0x107   :  { %1902 = vmatprep.subr.bf16.mxu0 %v4118_v18  ;;  %2107 = vmatprep.subr.bf16.mxu1 %v4121_v19  ;;  %v4211_v18 = vld [vmem:[#allocation5 + $0x62c] ss:$16 sps:$4 sm:$0xff]   ;;  %v131_v19 = vpack.c.bf16 %v122_v15, %v122_v15  ;;  %v4298_v15 = vld [vmem:[#allocation5 + $0x804] ss:$16 sps:$4 sm:$0xff]  }
 0x10a   :  { %1903 = vmatpush1.bf16.msra.mxu0 %v4116_v20  ;;  %2108 = vmatpush1.bf16.msra.mxu1 %v4119_v21  ;;  %v4206_v20 = vld [vmem:[#allocation5 + $0x620] ss:$16 sps:$4 sm:$0xff]   ;;  %v4209_v21 = vld [vmem:[#allocation5 + $0x628] ss:$16 sps:$4 sm:$0xff]  }
 0x10b   :  { %1904 = vmatprep.subr.bf16.mxu0 %v4124_v22  ;;  %2109 = vmatprep.subr.bf16.mxu1 %v4127_v23  ;;  %v4214_v22 = vld [vmem:[#allocation5 + $0x644] ss:$16 sps:$4 sm:$0xff]   ;;  %v4217_v23 = vld [vmem:[#allocation5 + $0x64c] ss:$16 sps:$4 sm:$0xff]  }
 0x10e   :  { %1905 = vmatpush1.bf16.msra.mxu0 %v4122_v24  ;;  %2110 = vmatpush1.bf16.msra.mxu1 %v4125_v25  ;;  %v4212_v24 = vld [vmem:[#allocation5 + $0x640] ss:$16 sps:$4 sm:$0xff]   ;;  %v4215_v25 = vld [vmem:[#allocation5 + $0x648] ss:$16 sps:$4 sm:$0xff]  }
 0x10f   :  { %1906 = vmatprep.subr.bf16.mxu0 %v4130_v26  ;;  %2111 = vmatprep.subr.bf16.mxu1 %v4133_v27  ;;  %v4220_v26 = vld [vmem:[#allocation5 + $0x664] ss:$16 sps:$4 sm:$0xff]   ;;  %v4223_v27 = vld [vmem:[#allocation5 + $0x66c] ss:$16 sps:$4 sm:$0xff]  }
 0x112   :  { %1907 = vmatpush1.bf16.msra.mxu0 %v4128_v28  ;;  %2112 = vmatpush1.bf16.msra.mxu1 %v4131_v29  ;;  %v4218_v28 = vld [vmem:[#allocation5 + $0x660] ss:$16 sps:$4 sm:$0xff]   ;;  %v4221_v29 = vld [vmem:[#allocation5 + $0x668] ss:$16 sps:$4 sm:$0xff]  }
 0x113   :  { %1908 = vmatprep.subr.bf16.mxu0 %v4136_v30  ;;  %2113 = vmatprep.subr.bf16.mxu1 %v4139_v31  ;;  %v4226_v30 = vld [vmem:[#allocation5 + $0x684] ss:$16 sps:$4 sm:$0xff]   ;;  %v4229_v31 = vld [vmem:[#allocation5 + $0x68c] ss:$16 sps:$4 sm:$0xff]  }
 0x116   :  { %1909 = vmatpush1.bf16.msra.mxu0 %v4134_v32  ;;  %2114 = vmatpush1.bf16.msra.mxu1 %v4137_v33  ;;  %v4224_v32 = vld [vmem:[#allocation5 + $0x680] ss:$16 sps:$4 sm:$0xff]   ;;  %v4227_v33 = vld [vmem:[#allocation5 + $0x688] ss:$16 sps:$4 sm:$0xff]  }
 0x117   :  { %1910 = vmatprep.subr.bf16.mxu0 %v4142_v34  ;;  %2115 = vmatprep.subr.bf16.mxu1 %v4145_v35  ;;  %v4232_v34 = vld [vmem:[#allocation5 + $0x6a4] ss:$16 sps:$4 sm:$0xff]   ;;  %v4235_v35 = vld [vmem:[#allocation5 + $0x6ac] ss:$16 sps:$4 sm:$0xff]  }
 0x11a   :  { %1911 = vmatpush1.bf16.msra.mxu0 %v4140_v36  ;;  %2116 = vmatpush1.bf16.msra.mxu1 %v4143_v37  ;;  %v4230_v36 = vld [vmem:[#allocation5 + $0x6a0] ss:$16 sps:$4 sm:$0xff]   ;;  %v4233_v37 = vld [vmem:[#allocation5 + $0x6a8] ss:$16 sps:$4 sm:$0xff]  }
 0x11b   :  { %1912 = vmatprep.subr.bf16.mxu0 %v4148_v38  ;;  %2117 = vmatprep.subr.bf16.mxu1 %v4151_v39  ;;  %v4238_v38 = vld [vmem:[#allocation5 + $0x6c4] ss:$16 sps:$4 sm:$0xff]   ;;  %v4241_v39 = vld [vmem:[#allocation5 + $0x6cc] ss:$16 sps:$4 sm:$0xff]  }
 0x11e   :  { %1913 = vmatpush1.bf16.msra.mxu0 %v4146_v40  ;;  %2118 = vmatpush1.bf16.msra.mxu1 %v4149_v41  ;;  %v4236_v40 = vld [vmem:[#allocation5 + $0x6c0] ss:$16 sps:$4 sm:$0xff]   ;;  %v4239_v41 = vld [vmem:[#allocation5 + $0x6c8] ss:$16 sps:$4 sm:$0xff]  }
 0x11f   :  { %1914 = vmatprep.subr.bf16.mxu0 %v4154_v42  ;;  %2119 = vmatprep.subr.bf16.mxu1 %v4157_v43  ;;  %v4244_v42 = vld [vmem:[#allocation5 + $0x6e4] ss:$16 sps:$4 sm:$0xff]   ;;  %v4247_v43 = vld [vmem:[#allocation5 + $0x6ec] ss:$16 sps:$4 sm:$0xff]  }
 0x122   :  { %1915 = vmatpush1.bf16.msra.mxu0 %v4152_v44  ;;  %2120 = vmatpush1.bf16.msra.mxu1 %v4155_v45  ;;  %v4242_v44 = vld [vmem:[#allocation5 + $0x6e0] ss:$16 sps:$4 sm:$0xff]   ;;  %v4245_v45 = vld [vmem:[#allocation5 + $0x6e8] ss:$16 sps:$4 sm:$0xff]  }
 0x123   :  { %1916 = vmatprep.subr.bf16.mxu0 %v4160_v46  ;;  %2121 = vmatprep.subr.bf16.mxu1 %v4163_v47  ;;  %v4250_v46 = vld [vmem:[#allocation5 + $0x704] ss:$16 sps:$4 sm:$0xff]   ;;  %v4253_v47 = vld [vmem:[#allocation5 + $0x70c] ss:$16 sps:$4 sm:$0xff]  }
 0x126   :  { %1917 = vmatpush1.bf16.msra.mxu0 %v4158_v48  ;;  %2122 = vmatpush1.bf16.msra.mxu1 %v4161_v49  ;;  %v4248_v48 = vld [vmem:[#allocation5 + $0x700] ss:$16 sps:$4 sm:$0xff]   ;;  %v4251_v49 = vld [vmem:[#allocation5 + $0x708] ss:$16 sps:$4 sm:$0xff]  }
 0x127   :  { %1918 = vmatprep.subr.bf16.mxu0 %v4166_v50  ;;  %2123 = vmatprep.subr.bf16.mxu1 %v4169_v51  ;;  %v4256_v50 = vld [vmem:[#allocation5 + $0x724] ss:$16 sps:$4 sm:$0xff]   ;;  %v4259_v51 = vld [vmem:[#allocation5 + $0x72c] ss:$16 sps:$4 sm:$0xff]  }
 0x12a   :  { %1919 = vmatpush1.bf16.msra.mxu0 %v4164_v52  ;;  %2124 = vmatpush1.bf16.msra.mxu1 %v4167_v53  ;;  %v4254_v52 = vld [vmem:[#allocation5 + $0x720] ss:$16 sps:$4 sm:$0xff]   ;;  %v4257_v53 = vld [vmem:[#allocation5 + $0x728] ss:$16 sps:$4 sm:$0xff]  }
 0x12b   :  { %1920 = vmatprep.subr.bf16.mxu0 %v4172_v54  ;;  %2125 = vmatprep.subr.bf16.mxu1 %v4175_v55  ;;  %v4262_v54 = vld [vmem:[#allocation5 + $0x744] ss:$16 sps:$4 sm:$0xff]   ;;  %v4265_v55 = vld [vmem:[#allocation5 + $0x74c] ss:$16 sps:$4 sm:$0xff]  }
 0x12e   :  { %1921 = vmatpush1.bf16.msra.mxu0 %v4170_v56  ;;  %2126 = vmatpush1.bf16.msra.mxu1 %v4173_v57  ;;  %v4260_v56 = vld [vmem:[#allocation5 + $0x740] ss:$16 sps:$4 sm:$0xff]   ;;  %v4263_v57 = vld [vmem:[#allocation5 + $0x748] ss:$16 sps:$4 sm:$0xff]  }
 0x12f   :  { %1922 = vmatprep.subr.bf16.mxu0 %v4178_v58  ;;  %2127 = vmatprep.subr.bf16.mxu1 %v4181_v59  ;;  %v4268_v58 = vld [vmem:[#allocation5 + $0x764] ss:$16 sps:$4 sm:$0xff]   ;;  %v4271_v59 = vld [vmem:[#allocation5 + $0x76c] ss:$16 sps:$4 sm:$0xff]  }
 0x132   :  { %1923 = vmatpush1.bf16.msra.mxu0 %v4176_v60  ;;  %2128 = vmatpush1.bf16.msra.mxu1 %v4179_v61  ;;  %v4266_v60 = vld [vmem:[#allocation5 + $0x760] ss:$16 sps:$4 sm:$0xff]   ;;  %v4269_v61 = vld [vmem:[#allocation5 + $0x768] ss:$16 sps:$4 sm:$0xff]  }
 0x133   :  { %1924 = vmatprep.subr.bf16.mxu0 %v4184_v62  ;;  %2129 = vmatprep.subr.bf16.mxu1 %v4187_v63  ;;  %v4274_v62 = vld [vmem:[#allocation5 + $0x784] ss:$16 sps:$4 sm:$0xff]   ;;  %v4277_v63 = vld [vmem:[#allocation5 + $0x78c] ss:$16 sps:$4 sm:$0xff]  }
 0x136   :  { %1925 = vmatpush1.bf16.msra.mxu0 %v4182_v0  ;;  %2130 = vmatpush1.bf16.msra.mxu1 %v4185_v1  ;;  %v4272_v0 = vld [vmem:[#allocation5 + $0x780] ss:$16 sps:$4 sm:$0xff]   ;;  %v4275_v1 = vld [vmem:[#allocation5 + $0x788] ss:$16 sps:$4 sm:$0xff]  }
 0x137   :  { %1926 = vmatprep.subr.bf16.mxu0 %v4190_v2  ;;  %2131 = vmatprep.subr.bf16.mxu1 %v4193_v3  ;;  %v4280_v2 = vld [vmem:[#allocation5 + $0x7a4] ss:$16 sps:$4 sm:$0xff]   ;;  %v4283_v3 = vld [vmem:[#allocation5 + $0x7ac] ss:$16 sps:$4 sm:$0xff]  }
 0x13a   :  { %1927 = vmatpush1.bf16.msra.mxu0 %v4188_v4  ;;  %2132 = vmatpush1.bf16.msra.mxu1 %v4191_v5  ;;  %v4278_v4 = vld [vmem:[#allocation5 + $0x7a0] ss:$16 sps:$4 sm:$0xff]   ;;  %v4281_v5 = vld [vmem:[#allocation5 + $0x7a8] ss:$16 sps:$4 sm:$0xff]  }
 0x13b   :  { %1928 = vmatprep.subr.bf16.mxu0 %v4196_v6  ;;  %2133 = vmatprep.subr.bf16.mxu1 %v4199_v7  ;;  %v4286_v6 = vld [vmem:[#allocation5 + $0x7c4] ss:$16 sps:$4 sm:$0xff]   ;;  %v4289_v7 = vld [vmem:[#allocation5 + $0x7cc] ss:$16 sps:$4 sm:$0xff]  }
 0x13e   :  { %1929 = vmatpush1.bf16.msra.mxu0 %v4194_v8  ;;  %2134 = vmatpush1.bf16.msra.mxu1 %v4197_v9  ;;  %v4284_v8 = vld [vmem:[#allocation5 + $0x7c0] ss:$16 sps:$4 sm:$0xff]   ;;  %v4287_v9 = vld [vmem:[#allocation5 + $0x7c8] ss:$16 sps:$4 sm:$0xff]  }
 0x13f   :  { %1939 = vmatprep.subr.bf16.mxu0 %v4202_v10  ;;  %2144 = vmatprep.subr.bf16.mxu1 %v4205_v12  ;;  %v4292_v10 = vld [vmem:[#allocation5 + $0x7e4] ss:$16 sps:$4 sm:$0xff]   ;;  %v4290_v12 = vld [vmem:[#allocation5 + $0x7e0] ss:$16 sps:$4 sm:$0xff]  }
 0x141   :  { %1931 = vmatmul.mubr.bf16.vlgmr.msra.gmra.mrb[0].mxu0 %v128_v14  ;;  %2136 = vmatmul.mubr.bf16.vlgmr.msra.gmra.mrb[0].mxu1 %v128_v14  ;;  %v121_v14 = vld [vmem:[#allocation2 + $0x30] sm:$0xff] }
 0x142   :  { %1940 = vmatpush1.bf16.msra.mxu0 %v4200_v13  ;;  %2145 = vmatpush1.bf16.msra.mxu1 %v4203_v16  ;;  %v4293_v13 = vld [vmem:[#allocation5 + $0x7e8] ss:$16 sps:$4 sm:$0xff]   ;;  %v4301_v16 = vld [vmem:[#allocation5 + $0x80c] ss:$16 sps:$4 sm:$0xff]  }
 0x143   :  { %1941 = vmatprep.subr.bf16.mxu0 %v4208_v17  ;;  %2146 = vmatprep.subr.bf16.mxu1 %v4211_v18  ;;  %v4296_v17 = vld [vmem:[#allocation5 + $0x800] ss:$16 sps:$4 sm:$0xff]   ;;  %v4299_v18 = vld [vmem:[#allocation5 + $0x808] ss:$16 sps:$4 sm:$0xff]  }
 0x144   :  { %1971 = vmatprep.mubr.bf16.mxu0 %v131_v19  ;;  %2176 = vmatprep.mubr.bf16.mxu1 %v131_v19  ;;  %v130_v19 = vpack.c.bf16 %v121_v14, %v121_v14  ;;  %v4363_v14 = vld [vmem:[#allocation8 + $0x108] ss:$12 sps:$4 sm:$0xff]  }
 0x146   :  { %1942 = vmatpush1.bf16.msra.mxu0 %v4206_v20  ;;  %2147 = vmatpush1.bf16.msra.mxu1 %v4209_v21  ;;  %v4304_v20 = vld [vmem:[#allocation5 + $0x824] ss:$16 sps:$4 sm:$0xff]   ;;  %v4307_v21 = vld [vmem:[#allocation5 + $0x82c] ss:$16 sps:$4 sm:$0xff]  }
 0x147   :  { %1943 = vmatprep.subr.bf16.mxu0 %v4214_v22  ;;  %2148 = vmatprep.subr.bf16.mxu1 %v4217_v23  ;;  %v4302_v22 = vld [vmem:[#allocation5 + $0x820] ss:$16 sps:$4 sm:$0xff]   ;;  %v4305_v23 = vld [vmem:[#allocation5 + $0x828] ss:$16 sps:$4 sm:$0xff]  }
 0x14a   :  { %1944 = vmatpush1.bf16.msra.mxu0 %v4212_v24  ;;  %2149 = vmatpush1.bf16.msra.mxu1 %v4215_v25  ;;  %v4310_v24 = vld [vmem:[#allocation5 + $0x844] ss:$16 sps:$4 sm:$0xff]   ;;  %v4313_v25 = vld [vmem:[#allocation5 + $0x84c] ss:$16 sps:$4 sm:$0xff]  }
 0x14b   :  { %1945 = vmatprep.subr.bf16.mxu0 %v4220_v26  ;;  %2150 = vmatprep.subr.bf16.mxu1 %v4223_v27  ;;  %v4675_v26 = vmov 0   ;;  %v4308_v27 = vld [vmem:[#allocation5 + $0x840] ss:$16 sps:$4 sm:$0xff]  }
 0x14e   :  { %1946 = vmatpush1.bf16.msra.mxu0 %v4218_v28  ;;  %2151 = vmatpush1.bf16.msra.mxu1 %v4221_v29  ;;  %v4311_v28 = vld [vmem:[#allocation5 + $0x848] ss:$16 sps:$4 sm:$0xff]   ;;  %v4316_v29 = vld [vmem:[#allocation5 + $0x864] ss:$16 sps:$4 sm:$0xff]  }
 0x14f   :  { %1947 = vmatprep.subr.bf16.mxu0 %v4226_v30  ;;  %2152 = vmatprep.subr.bf16.mxu1 %v4229_v31  ;;  %v4319_v30 = vld [vmem:[#allocation5 + $0x86c] ss:$16 sps:$4 sm:$0xff]   ;;  %v405_v31 = vld [vmem:[#allocation5 + $0x880] sm:$0xff] }
 0x152   :  { %1948 = vmatpush1.bf16.msra.mxu0 %v4224_v32  ;;  %2153 = vmatpush1.bf16.msra.mxu1 %v4227_v33  ;;  %v406_v32 = vld [vmem:[#allocation5 + $0x888] sm:$0xff]  ;;  %v4314_v33 = vld [vmem:[#allocation5 + $0x860] ss:$16 sps:$4 sm:$0xff]  }
 0x153   :  { %1949 = vmatprep.subr.bf16.mxu0 %v4232_v34  ;;  %2154 = vmatprep.subr.bf16.mxu1 %v4235_v35  ;;  %v4317_v34 = vld [vmem:[#allocation5 + $0x868] ss:$16 sps:$4 sm:$0xff]   ;;  %v3630_v35 = vcombine.high %v405_v31, %v405_v31 }
 0x156   :  { %1950 = vmatpush1.bf16.msra.mxu0 %v4230_v36  ;;  %2155 = vmatpush1.bf16.msra.mxu1 %v4233_v37  ;;  %v3632_v36 = vcombine.high %v406_v32, %v406_v32  ;;  %v3629_v37 = vcombine.low %v405_v31, %v405_v31 }
 0x157   :  { %1951 = vmatprep.subr.bf16.mxu0 %v4238_v38  ;;  %2156 = vmatprep.subr.bf16.mxu1 %v4241_v39  ;;  %v3631_v38 = vcombine.low %v406_v32, %v406_v32  ;;  %v123_v39 = vld [vmem:[#allocation2 + $0x40] sm:$0xff]  ;;  %v4806_v32 = vld [vmem:[#allocation7] sm:$0xf] }
 0x15a   :  { %1952 = vmatpush1.bf16.msra.mxu0 %v4236_v40  ;;  %2157 = vmatpush1.bf16.msra.mxu1 %v4239_v41  ;;  %v1805_v40 = vsel %vm1803_vm0, %v3629_v37, 0  ;;  %v1811_v41 = vsel %vm1803_vm0, %v3631_v38, 0 }
 0x15b   :  { %1953 = vmatprep.subr.bf16.mxu0 %v4244_v42  ;;  %2158 = vmatprep.subr.bf16.mxu1 %v4247_v43  ;;  %v4326_v42 = vld [vmem:[#allocation8 + $0x4] ss:$12 sps:$4 sm:$0xff]   ;;  %v4351_v43 = vld [vmem:[#allocation8 + $0xc8] ss:$12 sps:$4 sm:$0xff]  }
 0x15e   :  { %1954 = vmatpush1.bf16.msra.mxu0 %v4242_v44  ;;  %2159 = vmatpush1.bf16.msra.mxu1 %v4245_v45  ;;  %v132_v44 = vpack.c.bf16 %v123_v39, %v123_v39  ;;  %v4324_v45 = vld [vmem:[#allocation8] ss:$12 sps:$4 sm:$0xff]  }
 0x15f   :  { %1955 = vmatprep.subr.bf16.mxu0 %v4250_v46  ;;  %2160 = vmatprep.subr.bf16.mxu1 %v4253_v47  ;;  %v4352_v46 = vld [vmem:[#allocation8 + $0x8] ss:$12 sps:$4 sm:$0xff]  }
 0x160   :  { %v4329_v47 = vld [vmem:[#allocation8 + $0x1c] ss:$12 sps:$4 sm:$0xff]  }
 0x162   :  { %1956 = vmatpush1.bf16.msra.mxu0 %v4248_v48  ;;  %2161 = vmatpush1.bf16.msra.mxu1 %v4251_v49  ;;  %v4356_v48 = vld [vmem:[#allocation8 + $0xe0] ss:$12 sps:$4 sm:$0xff]   ;;  %v4327_v49 = vld [vmem:[#allocation8 + $0x18] ss:$12 sps:$4 sm:$0xff]  }
 0x163   :  { %1957 = vmatprep.subr.bf16.mxu0 %v4256_v50  ;;  %2162 = vmatprep.subr.bf16.mxu1 %v4259_v51  ;;  %v4357_v50 = vld [vmem:[#allocation8 + $0x20] ss:$12 sps:$4 sm:$0xff]  }
 0x164   :  { %v4332_v51 = vld [vmem:[#allocation8 + $0x34] ss:$12 sps:$4 sm:$0xff]  }
 0x166   :  { %1958 = vmatpush1.bf16.msra.mxu0 %v4254_v52  ;;  %2163 = vmatpush1.bf16.msra.mxu1 %v4257_v53  ;;  %v4361_v52 = vld [vmem:[#allocation8 + $0xf8] ss:$12 sps:$4 sm:$0xff]   ;;  %v4330_v53 = vld [vmem:[#allocation8 + $0x30] ss:$12 sps:$4 sm:$0xff]  }
 0x167   :  { %1959 = vmatprep.subr.bf16.mxu0 %v4262_v54  ;;  %2164 = vmatprep.subr.bf16.mxu1 %v4265_v55  ;;  %v4362_v54 = vld [vmem:[#allocation8 + $0x38] ss:$12 sps:$4 sm:$0xff]  }
 0x168   :  { %v4335_v55 = vld [vmem:[#allocation8 + $0x4c] ss:$12 sps:$4 sm:$0xff]  }
 0x16a   :  { %1960 = vmatpush1.bf16.msra.mxu0 %v4260_v56  ;;  %2165 = vmatpush1.bf16.msra.mxu1 %v4263_v57  ;;  %v4366_v56 = vld [vmem:[#allocation8 + $0x110] ss:$12 sps:$4 sm:$0xff]   ;;  %v4333_v57 = vld [vmem:[#allocation8 + $0x48] ss:$12 sps:$4 sm:$0xff]  }
 0x16b   :  { %1961 = vmatprep.subr.bf16.mxu0 %v4268_v58  ;;  %2166 = vmatprep.subr.bf16.mxu1 %v4271_v59  ;;  %v4367_v58 = vld [vmem:[#allocation8 + $0x50] ss:$12 sps:$4 sm:$0xff]  }
 0x16c   :  { %v4338_v59 = vld [vmem:[#allocation8 + $0x64] ss:$12 sps:$4 sm:$0xff]  }
 0x16e   :  { %1962 = vmatpush1.bf16.msra.mxu0 %v4266_v60  ;;  %2167 = vmatpush1.bf16.msra.mxu1 %v4269_v61  ;;  %v4371_v60 = vld [vmem:[#allocation8 + $0x128] ss:$12 sps:$4 sm:$0xff]   ;;  %v4336_v61 = vld [vmem:[#allocation8 + $0x60] ss:$12 sps:$4 sm:$0xff]  }
 0x16f   :  { %1963 = vmatprep.subr.bf16.mxu0 %v4274_v62  ;;  %2168 = vmatprep.subr.bf16.mxu1 %v4277_v63  ;;  %v4372_v62 = vld [vmem:[#allocation8 + $0x68] ss:$12 sps:$4 sm:$0xff]  }
 0x170   :  { %v4341_v63 = vld [vmem:[#allocation8 + $0x7c] ss:$12 sps:$4 sm:$0xff]  }
 0x172   :  { %1964 = vmatpush1.bf16.msra.mxu0 %v4272_v0  ;;  %2169 = vmatpush1.bf16.msra.mxu1 %v4275_v1  ;;  %v4376_v0 = vld [vmem:[#allocation8 + $0x140] ss:$12 sps:$4 sm:$0xff]   ;;  %v4339_v1 = vld [vmem:[#allocation8 + $0x78] ss:$12 sps:$4 sm:$0xff]  }
 0x173   :  { %1965 = vmatprep.subr.bf16.mxu0 %v4280_v2  ;;  %2170 = vmatprep.subr.bf16.mxu1 %v4283_v3  ;;  %v4377_v2 = vld [vmem:[#allocation8 + $0x80] ss:$12 sps:$4 sm:$0xff]  }
 0x174   :  { %v4344_v3 = vld [vmem:[#allocation8 + $0x94] ss:$12 sps:$4 sm:$0xff]  }
 0x176   :  { %1966 = vmatpush1.bf16.msra.mxu0 %v4278_v4  ;;  %2171 = vmatpush1.bf16.msra.mxu1 %v4281_v5  ;;  %v4342_v4 = vld [vmem:[#allocation8 + $0x90] ss:$12 sps:$4 sm:$0xff]   ;;  %v4347_v5 = vld [vmem:[#allocation8 + $0xac] ss:$12 sps:$4 sm:$0xff]  }
 0x177   :  { %1967 = vmatprep.subr.bf16.mxu0 %v4286_v6  ;;  %2172 = vmatprep.subr.bf16.mxu1 %v4289_v7  ;;  %v4345_v6 = vld [vmem:[#allocation8 + $0xa8] ss:$12 sps:$4 sm:$0xff]   ;;  %v4350_v7 = vld [vmem:[#allocation8 + $0xc4] ss:$12 sps:$4 sm:$0xff]  }
 0x17a   :  { %1968 = vmatpush1.bf16.msra.mxu0 %v4284_v8  ;;  %2173 = vmatpush1.bf16.msra.mxu1 %v4287_v9  ;;  %v4348_v8 = vld [vmem:[#allocation8 + $0xc0] ss:$12 sps:$4 sm:$0xff]   ;;  %v4355_v9 = vld [vmem:[#allocation8 + $0xdc] ss:$12 sps:$4 sm:$0xff]  }
 0x17b   :  { %1969 = vmatprep.subr.bf16.mxu0 %v4292_v10  ;;  %2174 = vmatprep.subr.bf16.mxu1 %v4295_v11  ;;  %v4353_v10 = vld [vmem:[#allocation8 + $0xd8] ss:$12 sps:$4 sm:$0xff]   ;;  %v4360_v11 = vld [vmem:[#allocation8 + $0xf4] ss:$12 sps:$4 sm:$0xff]  }
 0x17e   :  { %1970 = vmatpush1.bf16.msra.mxu0 %v4290_v12  ;;  %2175 = vmatpush1.bf16.msra.mxu1 %v4293_v13  ;;  %v4358_v12 = vld [vmem:[#allocation8 + $0xf0] ss:$12 sps:$4 sm:$0xff]   ;;  %v4365_v13 = vld [vmem:[#allocation8 + $0x10c] ss:$12 sps:$4 sm:$0xff]  }
 0x17f   :  { %1980 = vmatprep.subr.bf16.mxu0 %v4298_v15  ;;  %2185 = vmatprep.subr.bf16.mxu1 %v4301_v16  ;;  %v4370_v15 = vld [vmem:[#allocation8 + $0x124] ss:$12 sps:$4 sm:$0xff]   ;;  %v4368_v16 = vld [vmem:[#allocation8 + $0x120] ss:$12 sps:$4 sm:$0xff]  }
 0x181   :  { %1972 = vmatmul.mubr.bf16.vlgmr.msra.gmra.mrb[0].mxu0 %v130_v19  ;;  %2177 = vmatmul.mubr.bf16.vlgmr.msra.gmra.mrb[0].mxu1 %v130_v19  ;;  %v4380_v19 = vld [vmem:[#allocation8 + $0x154] ss:$12 sps:$4 sm:$0xff]  }
 0x182   :  { %1981 = vmatpush1.bf16.msra.mxu0 %v4296_v17  ;;  %2186 = vmatpush1.bf16.msra.mxu1 %v4299_v18  ;;  %v4375_v17 = vld [vmem:[#allocation8 + $0x13c] ss:$12 sps:$4 sm:$0xff]   ;;  %v4373_v18 = vld [vmem:[#allocation8 + $0x138] ss:$12 sps:$4 sm:$0xff]  }
 0x183   :  { %1982 = vmatprep.subr.bf16.mxu0 %v4304_v20  ;;  %2187 = vmatprep.subr.bf16.mxu1 %v4307_v21  ;;  %v4381_v20 = vld [vmem:[#allocation8 + $0x158] ss:$12 sps:$4 sm:$0xff]   ;;  %v4378_v21 = vld [vmem:[#allocation8 + $0x150] ss:$12 sps:$4 sm:$0xff]  }
 0x184   :  { %2012 = vmatprep.mubr.bf16.mxu0 %v4675_v26  ;;  %2217 = vmatprep.mubr.bf16.mxu1 %v4675_v26  ;;  %v4387_v26 = vld [vmem:[#allocation8 + $0xb0] ss:$12 sps:$4 sm:$0xff]  }
 0x186   :  { %1983 = vmatpush1.bf16.msra.mxu0 %v4302_v22  ;;  %2188 = vmatpush1.bf16.msra.mxu1 %v4305_v23  ;;  %v4382_v22 = vld [vmem:[#allocation8 + $0x98] ss:$12 sps:$4 sm:$0xff]  }
 0x187   :  { %1984 = vmatprep.subr.bf16.mxu0 %v4310_v24  ;;  %2189 = vmatprep.subr.bf16.mxu1 %v4313_v25  ;;  %v4385_v23 = vld [vmem:[#allocation8 + $0x16c] ss:$12 sps:$4 sm:$0xff]   ;;  %v4386_v24 = vld [vmem:[#allocation8 + $0x170] ss:$12 sps:$4 sm:$0xff]   ;;  %v4383_v25 = vld [vmem:[#allocation8 + $0x168] ss:$12 sps:$4 sm:$0xff]  }
 0x18a   :  { %1985 = vmatpush1.bf16.msra.mxu0 %v4308_v27  ;;  %2190 = vmatpush1.bf16.msra.mxu1 %v4311_v28  ;;  %v4390_v27 = vld [vmem:[#allocation8 + $0x184] ss:$12 sps:$4 sm:$0xff]   ;;  %v4391_v28 = vld [vmem:[#allocation8 + $0x248] ss:$12 sps:$4 sm:$0xff]  }
 0x18b   :  { %1986 = vmatprep.subr.bf16.mxu0 %v4316_v29  ;;  %2191 = vmatprep.subr.bf16.mxu1 %v4319_v30  ;;  %v409_v29 = vlaneseq }
 0x18d   :  { %v4803_v30 = vshrl.u32 %v409_v29, 7  ;;  %v4431_v29 = vld [vmem:[#allocation8 + $0x258] ss:$12 sps:$4 sm:$0xff]  }
 0x18e   :  { %1987 = vmatpush1.bf16.msra.mxu0 %v4314_v33  ;;  %2192 = vmatpush1.bf16.msra.mxu1 %v4317_v34 }
 0x18f   :  { %3633 = vmatprep.subr.msk.bf16.mxu0 %vm1803_vm0, %v3630_v35  ;;  %3635 = vmatprep.subr.msk.bf16.mxu1 %vm1803_vm0, %v3632_v36  ;;  %v411_v31 = vsub.s32 0, %v4803_v30  ;;  %v415_v33 = vsub.s32 1, %v4803_v30  ;;  %v423_v34 = vsub.s32 3, %v4803_v30 }
 0x191   :  { %v412_v35 = vrot.slane %v4806_v32, %v411_v31  ;;  %v416_v36 = vrot.slane %v4806_v32, %v415_v33  ;;  %v424_v37 = vrot.slane %v4806_v32, %v423_v34  ;;  %v4434_v34 = vld [vmem:[#allocation8 + $0x270] ss:$12 sps:$4 sm:$0xff]  }
 0x192   :  { %1989 = vmatpush1.bf16.msra.mxu0 %v1805_v40  ;;  %2194 = vmatpush1.bf16.msra.mxu1 %v1811_v41 }
 0x193   :  { %2891 = vmatprep.subr.bf16.mxu0 %v4326_v42  ;;  %3758 = vmatprep.subr.bf16.mxu1 %v4351_v43 }
 0x195   :  { %3634 = vmatmul.mubr.msk.bf16.vlgmr.msra.gmra.mrb[0].mxu0 %vm1799_vm1, %v132_v44  ;;  %3636 = vmatmul.mubr.msk.bf16.vlgmr.msra.gmra.mrb[0].mxu1 %vm1799_vm1, %v132_v44 }
 0x196   :  { %2892 = vmatpush1.bf16.msra.mxu0 %v4324_v45  ;;  %3759 = vmatpush3.bf16.msra.mxu1 %v4352_v46 }
 0x197   :  { %2893 = vmatprep.subr.bf16.mxu0 %v4329_v47  ;;  %3760 = vmatprep.subr.bf16.mxu1 %v4356_v48 }
 0x19a   :  { %2894 = vmatpush1.bf16.msra.mxu0 %v4327_v49  ;;  %3761 = vmatpush3.bf16.msra.mxu1 %v4357_v50 }
 0x19b   :  { %2895 = vmatprep.subr.bf16.mxu0 %v4332_v51  ;;  %3762 = vmatprep.subr.bf16.mxu1 %v4361_v52 }
 0x19e   :  { %2896 = vmatpush1.bf16.msra.mxu0 %v4330_v53  ;;  %3763 = vmatpush3.bf16.msra.mxu1 %v4362_v54  ;;  %v4388_v53 = vld [vmem:[#allocation8 + $0x180] ss:$12 sps:$4 sm:$0xff]   ;;  %v4392_v54 = vld [vmem:[#allocation8 + $0x188] ss:$12 sps:$4 sm:$0xff]  }
 0x19f   :  { %2897 = vmatprep.subr.bf16.mxu0 %v4335_v55  ;;  %3764 = vmatprep.subr.bf16.mxu1 %v4366_v56  ;;  %v4395_v56 = vld [vmem:[#allocation8 + $0x19c] ss:$12 sps:$4 sm:$0xff]  }
 0x1a2   :  { %2898 = vmatpush1.bf16.msra.mxu0 %v4333_v57  ;;  %3765 = vmatpush3.bf16.msra.mxu1 %v4367_v58  ;;  %v4396_v57 = vld [vmem:[#allocation8 + $0x260] ss:$12 sps:$4 sm:$0xff]  }
 0x1a3   :  { %2899 = vmatprep.subr.bf16.mxu0 %v4338_v59  ;;  %3766 = vmatprep.subr.bf16.mxu1 %v4371_v60  ;;  %v4393_v59 = vld [vmem:[#allocation8 + $0x198] ss:$12 sps:$4 sm:$0xff]   ;;  %v4397_v60 = vld [vmem:[#allocation8 + $0x1a0] ss:$12 sps:$4 sm:$0xff]  }
 0x1a6   :  { %2900 = vmatpush1.bf16.msra.mxu0 %v4336_v61  ;;  %3767 = vmatpush3.bf16.msra.mxu1 %v4372_v62  ;;  %v4400_v61 = vld [vmem:[#allocation8 + $0x1b4] ss:$12 sps:$4 sm:$0xff]   ;;  %v4401_v62 = vld [vmem:[#allocation8 + $0x278] ss:$12 sps:$4 sm:$0xff]  }
 0x1a7   :  { %2901 = vmatprep.subr.bf16.mxu0 %v4341_v63  ;;  %3768 = vmatprep.subr.bf16.mxu1 %v4376_v0  ;;  %v4398_v63 = vld [vmem:[#allocation8 + $0x1b0] ss:$12 sps:$4 sm:$0xff]   ;;  %v4402_v0 = vld [vmem:[#allocation8 + $0x1b8] ss:$12 sps:$4 sm:$0xff]  }
 0x1aa   :  { %2902 = vmatpush1.bf16.msra.mxu0 %v4339_v1  ;;  %3769 = vmatpush3.bf16.msra.mxu1 %v4377_v2  ;;  %v4405_v1 = vld [vmem:[#allocation8 + $0x1cc] ss:$12 sps:$4 sm:$0xff]   ;;  %v4406_v2 = vld [vmem:[#allocation8 + $0x290] ss:$12 sps:$4 sm:$0xff]  }
 0x1ab   :  { %2903 = vmatprep.subr.bf16.mxu0 %v4344_v3  ;;  %3770 = vmatprep.subr.bf16.mxu1 %v4381_v20  ;;  %v4403_v3 = vld [vmem:[#allocation8 + $0x1c8] ss:$12 sps:$4 sm:$0xff]   ;;  %v4425_v20 = vld [vmem:[#allocation8 + $0x22c] ss:$12 sps:$4 sm:$0xff]  }
 0x1ae   :  { %2904 = vmatpush1.bf16.msra.mxu0 %v4342_v4  ;;  %3771 = vmatpush3.bf16.msra.mxu1 %v4382_v22  ;;  %v4407_v4 = vld [vmem:[#allocation8 + $0x1d0] ss:$12 sps:$4 sm:$0xff]   ;;  %v4423_v22 = vld [vmem:[#allocation8 + $0x228] ss:$12 sps:$4 sm:$0xff]  }
 0x1af   :  { %2905 = vmatprep.subr.bf16.mxu0 %v4347_v5  ;;  %3772 = vmatprep.subr.bf16.mxu1 %v4386_v24  ;;  %v4410_v5 = vld [vmem:[#allocation8 + $0x1e4] ss:$12 sps:$4 sm:$0xff]  }
 0x1b2   :  { %2906 = vmatpush1.bf16.msra.mxu0 %v4345_v6  ;;  %3773 = vmatpush3.bf16.msra.mxu1 %v4387_v26  ;;  %v4411_v6 = vld [vmem:[#allocation8 + $0x2a8] ss:$12 sps:$4 sm:$0xff]   ;;  %v4428_v26 = vld [vmem:[#allocation8 + $0x240] ss:$12 sps:$4 sm:$0xff]  }
 0x1b3   :  { %2907 = vmatprep.subr.bf16.mxu0 %v4350_v7  ;;  %3780 = vmatprep.subr.bf16.mxu1 %v4391_v28  ;;  %v4408_v7 = vld [vmem:[#allocation8 + $0x1e0] ss:$12 sps:$4 sm:$0xff]   ;;  %v4433_v28 = vld [vmem:[#allocation8 + $0x25c] ss:$12 sps:$4 sm:$0xff]  }
 0x1b6   :  { %2908 = vmatpush1.bf16.msra.mxu0 %v4348_v8  ;;  %v4412_v8 = vld [vmem:[#allocation8 + $0x1e8] ss:$12 sps:$4 sm:$0xff]  }
 0x1b7   :  { %2909 = vmatprep.subr.bf16.mxu0 %v4355_v9  ;;  %v419_v9 = vsub.s32 2, %v4803_v30  ;;  %v4470_v30 = vld [vmem:[#allocation11 + $0x90] sm:$0xff]  }
 0x1ba   :  { %2910 = vmatpush1.bf16.msra.mxu0 %v4353_v10  ;;  %v4415_v10 = vld [vmem:[#allocation8 + $0x1fc] ss:$12 sps:$4 sm:$0xff]  }
 0x1bb   :  { %2911 = vmatprep.subr.bf16.mxu0 %v4360_v11  ;;  %v4416_v11 = vld [vmem:[#allocation8 + $0x2c0] ss:$12 sps:$4 sm:$0xff]  }
 0x1be   :  { %2912 = vmatpush1.bf16.msra.mxu0 %v4358_v12  ;;  %v4413_v12 = vld [vmem:[#allocation8 + $0x1f8] ss:$12 sps:$4 sm:$0xff]  }
 0x1bf   :  { %2913 = vmatprep.subr.bf16.mxu0 %v4365_v13  ;;  %v4417_v13 = vld [vmem:[#allocation8 + $0x200] ss:$12 sps:$4 sm:$0xff]  }
 0x1c2   :  { %2914 = vmatpush1.bf16.msra.mxu0 %v4363_v14  ;;  %v420_v14 = vrot.slane %v4806_v32, %v419_v9  ;;  %v4436_v32 = vld [vmem:[#allocation8 + $0x274] ss:$12 sps:$4 sm:$0xff]  }
 0x1c3   :  { %2915 = vmatprep.subr.bf16.mxu0 %v4370_v15  ;;  %v4420_v15 = vld [vmem:[#allocation8 + $0x214] ss:$12 sps:$4 sm:$0xff]  }
 0x1c6   :  { %2916 = vmatpush1.bf16.msra.mxu0 %v4368_v16  ;;  %v4421_v16 = vld [vmem:[#allocation8 + $0x2d8] ss:$12 sps:$4 sm:$0xff]  }
 0x1c7   :  { %2917 = vmatprep.subr.bf16.mxu0 %v4375_v17  ;;  %v4418_v17 = vld [vmem:[#allocation8 + $0x210] ss:$12 sps:$4 sm:$0xff]  }
 0x1ca   :  { %2918 = vmatpush1.bf16.msra.mxu0 %v4373_v18  ;;  %v4422_v18 = vld [vmem:[#allocation8 + $0x218] ss:$12 sps:$4 sm:$0xff]  }
 0x1cb   :  { %2919 = vmatprep.subr.bf16.mxu0 %v4380_v19 }
 0x1ce   :  { %2920 = vmatpush1.bf16.msra.mxu0 %v4378_v21  ;;  %v4426_v21 = vld [vmem:[#allocation8 + $0x2f0] ss:$12 sps:$4 sm:$0xff]  }
 0x1cf   :  { %2921 = vmatprep.subr.bf16.mxu0 %v4385_v23  ;;  %v4427_v23 = vld [vmem:[#allocation8 + $0x230] ss:$12 sps:$4 sm:$0xff]  }
 0x1d2   :  { %2922 = vmatpush1.bf16.msra.mxu0 %v4383_v25  ;;  %v4430_v25 = vld [vmem:[#allocation8 + $0x244] ss:$12 sps:$4 sm:$0xff]  }
 0x1d3   :  { %2932 = vmatprep.subr.bf16.mxu0 %v4390_v27 }
 0x268   :  { %v2014_v38 = vpop.f32.mrb[0].mxu0  ;;  %v4817_v39 = vpop.f32.mrb[0].mxu1 }
 0x269   :  { %v3853_v40 = vadd.f32 %v2014_v38, %v412_v35  ;;  %v2016_v41 = vpop.f32.mrb[1].mxu0  ;;  %v2221_v42 = vpop.f32.mrb[1].mxu1  ;;  %v3855_v19 = vadd.f32 %v4817_v39, %v420_v14  ;;  %v4439_v35 = vld [vmem:[#allocation8 + $0x28c] ss:$12 sps:$4 sm:$0xff]   ;;  %v4445_v39 = vld [vmem:[#allocation8 + $0x2bc] ss:$12 sps:$4 sm:$0xff]  }
 0x26a   :  { %v3854_v43 = vadd.f32 %v2016_v41, %v416_v36  ;;  %v3856_v44 = vadd.f32 %v2221_v42, %v424_v37  ;;  %v2018_v45 = vpop.f32.mrb[2].mxu0  ;;  %v2223_v46 = vpop.f32.mrb[2].mxu1  ;;  %v4437_v36 = vld [vmem:[#allocation8 + $0x288] ss:$12 sps:$4 sm:$0xff]   ;;  %v4442_v37 = vld [vmem:[#allocation8 + $0x2a4] ss:$12 sps:$4 sm:$0xff]  }
 0x26b   :  { %v2226_v47 = vmax.f32 %v3853_v40, 0.0  ;;  %v2019_v48 = vpop.f32.mrb[3].mxu0  ;;  %v2224_v49 = vpop.f32.mrb[3].mxu1  ;;  %v2228_v24 = vmax.f32 %v3855_v19, 0.0  ;;  %v4440_v38 = vld [vmem:[#allocation8 + $0x2a0] ss:$12 sps:$4 sm:$0xff]  }
 0x26c   :  { %v2227_v50 = vmax.f32 %v3854_v43, 0.0  ;;  %v2229_v51 = vmax.f32 %v3856_v44, 0.0  ;;  %v4443_v40 = vld [vmem:[#allocation8 + $0x2b8] ss:$12 sps:$4 sm:$0xff]   ;;  %v4448_v41 = vld [vmem:[#allocation8 + $0x2d4] ss:$12 sps:$4 sm:$0xff]  }
 0x26d   :  { %v2230_v55 = vpack.c.bf16 %v2226_v47, %v2226_v47  ;;  %v2232_v27 = vpack.c.bf16 %v2228_v24, %v2228_v24  ;;  %v4446_v42 = vld [vmem:[#allocation8 + $0x2d0] ss:$12 sps:$4 sm:$0xff]   ;;  %v4451_v43 = vld [vmem:[#allocation8 + $0x2ec] ss:$12 sps:$4 sm:$0xff]   ;;  %v4449_v44 = vld [vmem:[#allocation8 + $0x2e8] ss:$12 sps:$4 sm:$0xff]  }
 0x26e   :  { %v2231_v52 = vpack.c.bf16 %v2227_v50, %v2227_v50  ;;  %v2233_v58 = vpack.c.bf16 %v2229_v51, %v2229_v51  ;;  %v4452_v45 = vld [vmem:[#allocation11 + $0x40] sm:$0xff]   ;;  %v4454_v47 = vld [vmem:[#allocation11 + $0x48] sm:$0xff]   ;;  %v4456_v49 = vld [vmem:[#allocation11 + $0x50] sm:$0xff]  }
 0x26f   :  { %v4453_v46 = vld [vmem:[#allocation11] sm:$0xff]   ;;  %v4455_v48 = vld [vmem:[#allocation11 + $0x8] sm:$0xff]   ;;  %v4457_v50 = vld [vmem:[#allocation11 + $0x10] sm:$0xff]  }
 0x270   :  { %2923 = vmatprep.mubr.bf16.mxu0 %v2231_v52  ;;  %3005 = vmatprep.mubr.bf16.mxu1 %v2231_v52  ;;  %v4458_v51 = vld [vmem:[#allocation11 + $0x58] sm:$0xff]  }
 0x271   :  { %2924 = vmatmul.mubr.bf16.vlgmr.msra.gmra.mrb[4].mxu0 %v2230_v55  ;;  %3006 = vmatmul.mubr.bf16.vlgmr.msra.gmra.mrb[4].mxu1 %v2230_v55  ;;  %v4459_v52 = vld [vmem:[#allocation11 + $0x18] sm:$0xff]   ;;  %v4462_v55 = vld [vmem:[#allocation11 + $0x68] sm:$0xff]  }
 0x272   :  { %2933 = vmatpush1.bf16.msra.mxu0 %v4388_v53  ;;  %3781 = vmatpush3.bf16.msra.mxu1 %v4392_v54  ;;  %v4460_v53 = vld [vmem:[#allocation11 + $0x60] sm:$0xff]  }
 0x273   :  { %2964 = vmatprep.mubr.bf16.mxu0 %v2233_v58  ;;  %3045 = vmatprep.mubr.bf16.mxu1 %v2233_v58  ;;  %v4461_v54 = vld [vmem:[#allocation11 + $0x20] sm:$0xff]   ;;  %v4465_v58 = vld [vmem:[#allocation11 + $0x30] sm:$0xff]  }
 0x274   :  { %2934 = vmatprep.subr.bf16.mxu0 %v4395_v56  ;;  %3782 = vmatprep.subr.bf16.mxu1 %v4396_v57  ;;  %v4463_v56 = vld [vmem:[#allocation11 + $0x28] sm:$0xff]   ;;  %v4464_v57 = vld [vmem:[#allocation11 + $0x70] sm:$0xff]  }
 0x276   :  { %2935 = vmatpush1.bf16.msra.mxu0 %v4393_v59  ;;  %3783 = vmatpush3.bf16.msra.mxu1 %v4397_v60  ;;  %v4466_v59 = vld [vmem:[#allocation11 + $0x78] sm:$0xff]  }
 0x277   :  { %2936 = vmatprep.subr.bf16.mxu0 %v4400_v61  ;;  %3784 = vmatprep.subr.bf16.mxu1 %v4401_v62  ;;  %v4467_v60 = vld [vmem:[#allocation11 + $0x38] sm:$0xff]   ;;  %v4676_v61 = vmov 0.0  }
 0x27a   :  { %2937 = vmatpush1.bf16.msra.mxu0 %v4398_v63  ;;  %3785 = vmatpush3.bf16.msra.mxu1 %v4402_v0 }
 0x27b   :  { %2938 = vmatprep.subr.bf16.mxu0 %v4405_v1  ;;  %3786 = vmatprep.subr.bf16.mxu1 %v4406_v2 }
 0x27e   :  { %2939 = vmatpush1.bf16.msra.mxu0 %v4403_v3  ;;  %3787 = vmatpush3.bf16.msra.mxu1 %v4407_v4  ;;  %v2362_v3 = vld [vmem:[#allocation10] sm:$0x7] }
 0x27f   :  { %2940 = vmatprep.subr.bf16.mxu0 %v4410_v5  ;;  %3788 = vmatprep.subr.bf16.mxu1 %v4411_v6  ;;  %v2375_v4 = vrot.slane %v2362_v3, %v419_v9  ;;  %v2371_v14 = vrot.slane %v2362_v3, %v415_v33  ;;  %v4472_v33 = vld [vmem:[#allocation11 + $0xa0] sm:$0xff]  }
 0x282   :  { %2941 = vmatpush1.bf16.msra.mxu0 %v4408_v7  ;;  %3789 = vmatpush3.bf16.msra.mxu1 %v4412_v8 }
 0x283   :  { %2942 = vmatprep.subr.bf16.mxu0 %v4415_v10  ;;  %3790 = vmatprep.subr.bf16.mxu1 %v4416_v11 }
 0x286   :  { %2943 = vmatpush1.bf16.msra.mxu0 %v4413_v12  ;;  %3791 = vmatpush3.bf16.msra.mxu1 %v4417_v13  ;;  %v2367_v13 = vrot.slane %v2362_v3, %v411_v31  ;;  %v4471_v31 = vld [vmem:[#allocation11 + $0x98] sm:$0xff]  }
 0x287   :  { %2944 = vmatprep.subr.bf16.mxu0 %v4420_v15  ;;  %3792 = vmatprep.subr.bf16.mxu1 %v4421_v16 }
 0x28a   :  { %2945 = vmatpush1.bf16.msra.mxu0 %v4418_v17  ;;  %3793 = vmatpush3.bf16.msra.mxu1 %v4422_v18 }
 0x28b   :  { %2946 = vmatprep.subr.bf16.mxu0 %v4425_v20  ;;  %3794 = vmatprep.subr.bf16.mxu1 %v4426_v21 }
 0x28e   :  { %2947 = vmatpush1.bf16.msra.mxu0 %v4423_v22  ;;  %3795 = vmatpush3.bf16.msra.mxu1 %v4427_v23  ;;  %v4468_v23 = vld [vmem:[#allocation11 + $0x80] sm:$0xff]  }
 0x28f   :  { %2948 = vmatprep.subr.bf16.mxu0 %v4430_v25  ;;  %3802 = vmatprep.subr.bf16.mxu1 %v4452_v45  ;;  %v4469_v25 = vld [vmem:[#allocation11 + $0x88] sm:$0xff]  }
 0x291   :  { %3046 = vmatmul.mubr.bf16.vlgmr.msra.gmra.mrb[8].mxu1 %v2232_v27 }
 0x292   :  { %2949 = vmatpush1.bf16.msra.mxu0 %v4428_v26  ;;  %3803 = vmatpush3.bf16.msra.mxu1 %v4453_v46  ;;  %v4473_v26 = vld [vmem:[#allocation11 + $0xa8] sm:$0xff]  }
 0x293   :  { %2950 = vmatprep.subr.bf16.mxu0 %v4433_v28  ;;  %3804 = vmatprep.subr.bf16.mxu1 %v4454_v47  ;;  %v4475_v28 = vld [vmem:[#allocation11 + $0xb8] sm:$0xff]  }
 0x296   :  { %2951 = vmatpush1.bf16.msra.mxu0 %v4431_v29  ;;  %3805 = vmatpush3.bf16.msra.mxu1 %v4455_v48 }
 0x297   :  { %2952 = vmatprep.subr.bf16.mxu0 %v4436_v32  ;;  %3806 = vmatprep.subr.bf16.mxu1 %v4456_v49 }
 0x29a   :  { %2953 = vmatpush1.bf16.msra.mxu0 %v4434_v34  ;;  %3807 = vmatpush3.bf16.msra.mxu1 %v4457_v50 }
 0x29b   :  { %2954 = vmatprep.subr.bf16.mxu0 %v4439_v35  ;;  %3808 = vmatprep.subr.bf16.mxu1 %v4458_v51 }
 0x29e   :  { %2955 = vmatpush1.bf16.msra.mxu0 %v4437_v36  ;;  %3809 = vmatpush3.bf16.msra.mxu1 %v4459_v52 }
 0x29f   :  { %2956 = vmatprep.subr.bf16.mxu0 %v4442_v37  ;;  %3810 = vmatprep.subr.bf16.mxu1 %v4460_v53 }
 0x2a2   :  { %2957 = vmatpush1.bf16.msra.mxu0 %v4440_v38  ;;  %3811 = vmatpush3.bf16.msra.mxu1 %v4461_v54 }
 0x2a3   :  { %2958 = vmatprep.subr.bf16.mxu0 %v4445_v39  ;;  %3812 = vmatprep.subr.bf16.mxu1 %v4462_v55  ;;  %v3733_v39 = vld [vmem:[#allocation13] ss:$0 sm:$0xff] }
 0x2a6   :  { %2959 = vmatpush1.bf16.msra.mxu0 %v4443_v40  ;;  %3813 = vmatpush3.bf16.msra.mxu1 %v4463_v56 }
 0x2a7   :  { %2960 = vmatprep.subr.bf16.mxu0 %v4448_v41  ;;  %3814 = vmatprep.subr.bf16.mxu1 %v4464_v57 }
 0x2aa   :  { %2961 = vmatpush1.bf16.msra.mxu0 %v4446_v42  ;;  %3815 = vmatpush3.bf16.msra.mxu1 %v4465_v58 }
 0x2ab   :  { %2962 = vmatprep.subr.bf16.mxu0 %v4451_v43  ;;  %3816 = vmatprep.subr.bf16.mxu1 %v4466_v59 }
 0x2ae   :  { %2963 = vmatpush1.bf16.msra.mxu0 %v4449_v44  ;;  %3817 = vmatpush3.bf16.msra.mxu1 %v4467_v60 }
 0x2af   :  { %3833 = vmatprep.subr.bf16.mxu1 %v4676_v61 }
 0x2b1   :  { %2965 = vmatmul.mubr.bf16.vlgmr.msra.gmra.mrb[4].mxu0 %v2232_v27  ;;  %v4474_v27 = vld [vmem:[#allocation11 + $0xb0] sm:$0xff]  }
 0x344   :  { %v3774_v62 = vpop.f32.mrb[4].mxu1 }
 0x345   :  { %v3775_v63 = vpop.f32.mrb[5].mxu1 }
 0x346   :  { %v3776_v0 = vadd.f32 %v3775_v63, %v3774_v62  ;;  %v3777_v1 = vpop.f32.mrb[6].mxu1 }
 0x347   :  { %v3778_v2 = vpop.f32.mrb[7].mxu1 }
 0x348   :  { %v3008_v7 = vadd.f32 %v3776_v0, %v2375_v4 }
 0x364   :  { %v3796_v5 = vpop.f32.mrb[8].mxu1 }
 0x365   :  { %v3797_v6 = vpop.f32.mrb[9].mxu1 }
 0x366   :  { %v3798_v8 = vadd.f32 %v3797_v6, %v3796_v5  ;;  %v3799_v10 = vpop.f32.mrb[10].mxu1 }
 0x367   :  { %v3800_v11 = vpop.f32.mrb[11].mxu1 }
 0x368   :  { %v3048_v12 = vadd.f32 %v3798_v8, %v3008_v7 }
 0x36a   :  { %v3055_v29 = vmax.f32 %v3048_v12, 0.0 }
 0x36c   :  { %v3058_v32 = vpack.c.bf16 %v3055_v29, %v3055_v29 }
 0x384   :  { %v2966_v15 = vpop.f32.mrb[4].mxu0 }
 0x385   :  { %v3857_v16 = vadd.f32 %v2966_v15, %v2367_v13  ;;  %v2968_v17 = vpop.f32.mrb[5].mxu0 }
 0x386   :  { %v3858_v18 = vadd.f32 %v2968_v17, %v2371_v14  ;;  %v2970_v19 = vpop.f32.mrb[6].mxu0 }
 0x387   :  { %v3053_v20 = vmax.f32 %v3857_v16, 0.0  ;;  %v2971_v9 = vpop.f32.mrb[7].mxu0 }
 0x388   :  { %v3054_v21 = vmax.f32 %v3858_v18, 0.0 }
 0x389   :  { %v3056_v24 = vpack.c.bf16 %v3053_v20, %v3053_v20 }
 0x38a   :  { %v3057_v22 = vpack.c.bf16 %v3054_v21, %v3054_v21 }
 0x38c   :  { %3290 = vmatprep.mubr.bf16.mxu1 %v3057_v22 }
 0x38d   :  { %3291 = vmatmul.mubr.bf16.vlgmr.msra.gmra.mrb[12].mxu1 %v3056_v24 }
 0x38e   :  { %3834 = vmatpush3.bf16.msra.mxu1 %v4468_v23  ;;  %3849 = vmatprep.mubr.msk.bf16.mxu1 %vm4677_vm2, %v4676_v61 }
 0x38f   :  { %3835 = vmatprep.subr.bf16.mxu1 %v4676_v61 }
 0x392   :  { %3836 = vmatpush3.bf16.msra.mxu1 %v4469_v25 }
 0x393   :  { %3837 = vmatprep.subr.bf16.mxu1 %v4676_v61 }
 0x396   :  { %3838 = vmatpush3.bf16.msra.mxu1 %v4470_v30 }
 0x397   :  { %3839 = vmatprep.subr.bf16.mxu1 %v4676_v61 }
 0x39a   :  { %3840 = vmatpush3.bf16.msra.mxu1 %v4471_v31 }
 0x39b   :  { %3841 = vmatprep.subr.bf16.mxu1 %v4676_v61 }
 0x39e   :  { %3842 = vmatpush3.bf16.msra.mxu1 %v4472_v33 }
 0x39f   :  { %3843 = vmatprep.subr.bf16.mxu1 %v4676_v61 }
 0x3a2   :  { %3844 = vmatpush3.bf16.msra.mxu1 %v4473_v26 }
 0x3a3   :  { %3845 = vmatprep.subr.bf16.mxu1 %v4676_v61 }
 0x3a6   :  { %3846 = vmatpush3.bf16.msra.mxu1 %v4474_v27 }
 0x3a7   :  { %3847 = vmatprep.subr.bf16.mxu1 %v4676_v61 }
 0x3aa   :  { %3848 = vmatpush3.bf16.msra.mxu1 %v4475_v28 }
 0x3ad   :  { %3850 = vmatmul.mubr.bf16.vlgmr.msra.gmra.mrb[16].mxu1 %v3058_v32 }
 0x460   :  { %v3818_v34 = vpop.f32.mrb[12].mxu1 }
 0x461   :  { %v3819_v35 = vpop.f32.mrb[13].mxu1 }
 0x462   :  { %v3820_v36 = vadd.f32 %v3819_v35, %v3818_v34  ;;  %v3821_v37 = vpop.f32.mrb[14].mxu1 }
 0x463   :  { %v3822_v38 = vpop.f32.mrb[15].mxu1 }
 0x464   :  { %v3293_v40 = vadd.f32 %v3820_v36, %v3733_v39 }
 0x480   :  { %v3332_v41 = vpop.f32.mrb[16].mxu1 }
 0x481   :  { %v3333_v42 = vadd.f32 %v3332_v41, %v3293_v40  ;;  %v3851_v43 = vpop.f32.mrb[17].mxu1 }
 0x482   :  { %v3335_v44 = vpop.f32.mrb[18].mxu1 }
 0x483   :  { %3338 = vst [vmem:[#allocation14] sm:$0xff] %v3333_v42  ;;  %v3852_v45 = vpop.f32.mrb[19].mxu1 }
 0x484   :  { %4641 = shalt.err (!%p4638_p4)
}
 0x485   :  { %s4642_s16 = scalar_lea.hbm %s4849_s7, 128 }
 0x486   :  { %p4643_p5 = scmp.ne.s32.totalorder %s4849_s7, %s4642_s16  ;;  %p4646_p6 = scmp.lt.u32.totalorder %s4642_s16, %s4849_s7 }
 0x488   :  { %p4648_p7 = pnand %p4646_p6, %p4643_p5 }
 0x48a   :  { %4651 = shalt.err (!%p4648_p7)
}
 0x48b   :  { %3348 = dma.vmem_to_hbm [thread:$0]  %s3346_s14, 128, %s4849_s7, [#allocation4]  }
 0x48c   :  { %4660 = dma.done.wait [#allocation4], 128  }
 0x48d   :  { %4661 = vsyncadd [#allocation4], 4294967168 }
 0x48e   :  { %3352 = vsyncpa [#allocation3], 1 }
 0x48f   :  { %3353 = vsyncpa [#allocation6], 1 }
 0x490   :  { %3354 = vsyncpa [#allocation9], 1 }
 0x491   :  { %3355 = vsyncpa [#allocation12], 1 }
 0x492   :  { %3356 = vsyncpa [#allocation4], 1 }

</bundles_post_ra>
